<compile_context>
chip_gen: v7x
topology: tpu7x:2x2x1
jax: 0.10.0
libtpu: 0.0.40
codegen_flags: <defaults>
</compile_context>

<pallas_src>
import functools
import math

import numpy as np

import jax
import jax.numpy as jnp
from jax.experimental import pallas as pl
from jax.experimental.pallas import tpu as pltpu


# -----------------------------------------------------------------------------
# Fused encoder kernel (one invocation per batch-block of NB images)
# -----------------------------------------------------------------------------
def _encoder_kernel(alpha_ref, x_ref, w1_ref, w2_ref, w3_ref,
                    d12_ref, d23_ref, s12_ref, s23_ref,
                    enc1_ref, enc2_ref, enc3_ref, *, h1, h2, h3):
    alpha = alpha_ref[0]                                  # PReLU slope (SMEM)

    def prelu(v):                                         # f32 VPU path
        return jnp.where(v >= 0.0, v, alpha * v)

    def level(a, w_ref, h_img):
        # a: (M, W*C) f32 slab holding NB images of h_img rows each.
        m = a.shape[0]
        row = jax.lax.broadcasted_iota(jnp.int32, (m, 1), 0) % h_img
        top = row == 0                                    # first row per image
        bot = row == (h_img - 1)                          # last row per image

        def shifted_slab(v):
            # f32 (M, WC) -> bf16 (M, 3*WC): [v[h-1] | v[h] | v[h+1]] with
            # zeroed halo rows at per-image boundaries.  pltpu.roll runs on
            # the XLU (doesn't compete with VPU/MXU); no VMEM pad round trip.
            up = jnp.where(top, 0.0, pltpu.roll(v, 1, 0))        # v[h-1]
            dn = jnp.where(bot, 0.0, pltpu.roll(v, m - 1, 0))    # v[h+1]
            return jnp.concatenate(
                [up.astype(jnp.bfloat16), v.astype(jnp.bfloat16),
                 dn.astype(jnp.bfloat16)], axis=1)

        for b in range(2):                                # 2 ResBlocks / level
            h = prelu(jnp.dot(shifted_slab(a), w_ref[2 * b],
                              preferred_element_type=jnp.float32))
            h = jnp.dot(shifted_slab(h), w_ref[2 * b + 1],
                        preferred_element_type=jnp.float32)
            a = a + h                                     # residual add (f32)
        return a

    def downsample(a, s_ref, d_ref):
        # bilinear 0.5x (== 2x2 avg-pool on even sizes) + 1x1 conv ==
        # row-pair-sum matmul, then a banded matmul with 0.25 folded in.
        pooled = jnp.dot(s_ref[...], a.astype(jnp.bfloat16),
                         preferred_element_type=jnp.float32)
        return jnp.dot(pooled.astype(jnp.bfloat16), d_ref[...],
                       preferred_element_type=jnp.float32)

    x = x_ref[0].astype(jnp.float32)                      # (NB*H, W*C1)

    e1 = level(x, w1_ref, h1)
    enc1_ref[0] = e1.astype(enc1_ref.dtype)

    e2 = level(downsample(e1, s12_ref, d12_ref), w2_ref, h2)
    enc2_ref[0] = e2.astype(enc2_ref.dtype)

    e3 = level(downsample(e2, s23_ref, d23_ref), w3_ref, h3)
    enc3_ref[0] = e3.astype(enc3_ref.dtype)


# -----------------------------------------------------------------------------
# Wrapper: layout plumbing + single pallas_call
# -----------------------------------------------------------------------------
def _pick_block_batch(n, h, max_rows=256):
    """Largest divisor of n with nb*h <= max_rows, keeping >= 2 grid steps
    when the batch allows it (so both v7x TensorCores get work)."""
    divs = [d for d in range(1, n + 1) if n % d == 0 and d * h <= max_rows]
    if not divs:
        return 1
    nb = max(divs)
    two_step = [d for d in divs if n // d >= 2]
    if two_step:
        nb = max(two_step)
    return nb


def _pool_rows(m_out, m_in):
    """(m_out, m_in) 0/1 matrix summing consecutive row pairs (H pooling)."""
    s = np.zeros((m_out, m_in), np.float32)
    r = np.arange(m_out)
    s[r, 2 * r] = 1.0
    s[r, 2 * r + 1] = 1.0
    return s


def encoder_forward(x_nchw, params, *, chans, block_batch=None):
    N, C1, H, W = x_nchw.shape
    _, c2, c3 = chans
    assert H % 4 == 0 and W % 4 == 0      # bilinear-0.5x == 2x2 avg identity
    H2, H3, W2, W3 = H // 2, H // 4, W // 2, W // 4

    alpha = params["alpha"]
    w1, w2, w3 = params["w1"], params["w2"], params["w3"]
    d12, d23 = params["d12"], params["d23"]

    WC1, WC2, WC3 = w1.shape[2], w2.shape[2], w3.shape[2]
    C1p, C2p, C3p = WC1 // W, WC2 // W2, WC3 // W3        # lane-padded channels

    NB = block_batch if block_batch is not None else _pick_block_batch(N, H)
    assert N % NB == 0
    G = N // NB
    M1, M2, M3 = NB * H, NB * H2, NB * H3

    # NCHW -> lane-packed (G, NB*H, W*C1p) slabs.
    xh = jnp.transpose(x_nchw, (0, 2, 3, 1))              # NHWC
    if C1p > C1:
        xh = jnp.pad(xh, ((0, 0), (0, 0), (0, 0), (0, C1p - C1)))
    x2d = xh.reshape(G, M1, WC1)

    # Host-built row-pair-sum matrices; pairs never cross image boundaries
    # because every per-image H is even, so one flat matrix covers the slab.
    s12 = jnp.asarray(_pool_rows(M2, M1), jnp.bfloat16)
    s23 = jnp.asarray(_pool_rows(M3, M2), jnp.bfloat16)

    out_shapes = (
        jax.ShapeDtypeStruct((G, M1, WC1), x_nchw.dtype),
        jax.ShapeDtypeStruct((G, M2, WC2), x_nchw.dtype),
        jax.ShapeDtypeStruct((G, M3, WC3), x_nchw.dtype),
    )
    in_specs = [
        pl.BlockSpec(memory_space=pltpu.SMEM),            # PReLU alpha scalar
        pl.BlockSpec((1, M1, WC1), lambda n: (n, 0, 0)),   # input slab
        pl.BlockSpec(w1.shape, lambda n: (0, 0, 0)),       # level1 weights
        pl.BlockSpec(w2.shape, lambda n: (0, 0, 0)),       # level2 weights
        pl.BlockSpec(w3.shape, lambda n: (0, 0, 0)),       # level3 weights
        pl.BlockSpec(d12.shape, lambda n: (0, 0)),         # down12 banded 1x1
        pl.BlockSpec(d23.shape, lambda n: (0, 0)),         # down23 banded 1x1
        pl.BlockSpec(s12.shape, lambda n: (0, 0)),         # H-pool matrix 1->2
        pl.BlockSpec(s23.shape, lambda n: (0, 0)),         # H-pool matrix 2->3
    ]
    out_specs = (
        pl.BlockSpec((1, M1, WC1), lambda n: (n, 0, 0)),
        pl.BlockSpec((1, M2, WC2), lambda n: (n, 0, 0)),
        pl.BlockSpec((1, M3, WC3), lambda n: (n, 0, 0)),
    )

    kernel = functools.partial(_encoder_kernel, h1=H, h2=H2, h3=H3)
    enc1_2d, enc2_2d, enc3_2d = pl.pallas_call(
        kernel,
        out_shape=out_shapes,
        grid=(G,),
        in_specs=in_specs,
        out_specs=out_specs,
        compiler_params=pltpu.CompilerParams(
            dimension_semantics=("parallel",)),
    )(alpha, x2d, w1, w2, w3, d12, d23, s12, s23)

    enc1 = jnp.transpose(enc1_2d.reshape(N, H, W, C1p)[..., :C1], (0, 3, 1, 2))
    enc2 = jnp.transpose(enc2_2d.reshape(N, H2, W2, C2p)[..., :c2], (0, 3, 1, 2))
    enc3 = jnp.transpose(enc3_2d.reshape(N, H3, W3, C3p)[..., :c3], (0, 3, 1, 2))
    return [enc1, enc2, enc3]


# -----------------------------------------------------------------------------
# Parameter init + weight packing (host-side, done once)
# -----------------------------------------------------------------------------
def _pad_channels(c, wl, lane=128):
    """Smallest cp >= c such that wl*cp is a multiple of `lane` (lane-dense)."""
    step = lane // math.gcd(wl, lane)
    return ((c + step - 1) // step) * step


def _fold_doconv(key, cin, cout, k):
    """Fold DO-Conv (D, W) into a standard conv weight (Cout, Cin, K, K)."""
    kw_key, kd_key = jax.random.split(key)
    dmul = k * k
    Wp = jax.random.normal(kw_key, (cout, cin, dmul), jnp.float32) * 0.1
    D = jax.random.normal(kd_key, (cin, k * k, dmul), jnp.float32) * 0.1
    D_diag = jnp.tile(jnp.eye(k * k, dmul, dtype=jnp.float32)[None], (cin, 1, 1))
    DoW = jnp.einsum("ims,ois->oim", D + D_diag, Wp)
    return DoW.reshape(cout, cin, k, k)


def _band3_from_conv(dow, wl, cp):
    """(C,C,3,3) conv weight -> (3*wl*cp, wl*cp) stacked banded matrix.

    Row block kh covers input rows h-1+kh, so multiplying against the kernel's
    lane-concatenated [x[h-1] | x[h] | x[h+1]] slab does the whole 3x3 conv in
    ONE K=3*wl*cp matmul.  Channels are zero-padded from c to cp (lane-dense).
    """
    dow = np.asarray(dow)
    cout, cin, K, _ = dow.shape
    band = np.zeros((K, wl * cp, wl * cp), np.float32)
    for kh in range(K):
        for kw in range(K):
            tap = dow[:, :, kh, kw].T                      # (Cin, Cout)
            for w in range(wl):
                wi = w + kw - K // 2
                if 0 <= wi < wl:
                    band[kh, wi * cp:wi * cp + cin,
                         w * cp:w * cp + cout] = tap
    return band.reshape(K * wl * cp, wl * cp)


def _band_from_1x1(w1x1, wl, cin_p, cout_p):
    """(Cout,Cin) 1x1 conv -> (wl*cin_p, (wl/2)*cout_p), 0.25 avg folded in."""
    w1x1 = np.asarray(w1x1)
    cout, cin = w1x1.shape
    wo_n = wl // 2
    bd = np.zeros((wl * cin_p, wo_n * cout_p), np.float32)
    tap = 0.25 * w1x1.T                                    # (Cin, Cout)
    for wo in range(wo_n):
        for dw in (0, 1):
            wi = 2 * wo + dw
            bd[wi * cin_p:wi * cin_p + cin,
               wo * cout_p:wo * cout_p + cout] = tap
    return bd


def init_encoder_params(key, wf, scale, vscale, ksize, H, W):
    assert ksize == 3 and H % 4 == 0 and W % 4 == 0
    c1, c2, c3 = wf, wf + scale, wf + scale + vscale
    cp1 = _pad_channels(c1, W)
    cp2 = _pad_channels(c2, W // 2)
    cp3 = _pad_channels(c3, W // 4)
    keys = iter(jax.random.split(key, 64))

    params = {"alpha": jnp.full((1,), 0.25, jnp.float32)}  # nn.PReLU() default
    raw = {"alpha": 0.25}

    for pname, rname, c, cp, wl in (("w1", "level1", c1, cp1, W),
                                    ("w2", "level2", c2, cp2, W // 2),
                                    ("w3", "level3", c3, cp3, W // 4)):
        bands, raw_blocks = [], []
        for _ in range(2):                                 # 2 ResBlocks / level
            dw1 = _fold_doconv(next(keys), c, c, ksize)
            dw2 = _fold_doconv(next(keys), c, c, ksize)
            raw_blocks.append((dw1, dw2))
            bands.append(_band3_from_conv(dw1, wl, cp))
            bands.append(_band3_from_conv(dw2, wl, cp))
        # (4 convs, 3*wl*cp, wl*cp); matmul operands in bf16 (MXU-native),
        # accumulation stays f32 inside the kernel.
        params[pname] = jnp.asarray(np.stack(bands), jnp.bfloat16)
        raw[rname] = raw_blocks

    w12 = jax.random.normal(next(keys), (c2, c1), jnp.float32) * 0.1   # no bias
    w23 = jax.random.normal(next(keys), (c3, c2), jnp.float32) * 0.1
    params["d12"] = jnp.asarray(_band_from_1x1(w12, W, cp1, cp2), jnp.bfloat16)
    params["d23"] = jnp.asarray(_band_from_1x1(w23, W // 2, cp2, cp3), jnp.bfloat16)
    raw["w12"], raw["w23"] = w12, w23
    return params, raw


# -----------------------------------------------------------------------------
# Plain-JAX reference (same folded weights, f32) for a numerical cross-check
# -----------------------------------------------------------------------------
def encoder_reference(x_nchw, raw):
    alpha = raw["alpha"]

    def prelu(v):
        return jnp.where(v >= 0, v, alpha * v)

    def conv(h, dow):
        w = jnp.transpose(dow, (2, 3, 1, 0))               # HWIO
        return jax.lax.conv_general_dilated(
            h, w, window_strides=(1, 1), padding="SAME",
            dimension_numbers=("NHWC", "HWIO", "NHWC"))

    def block(h, dw1, dw2):
        return conv(prelu(conv(h, dw1)), dw2) + h

    def down(h, w1x1):
        p = 0.25 * (h[:, 0::2, 0::2, :] + h[:, 0::2, 1::2, :]
                    + h[:, 1::2, 0::2, :] + h[:, 1::2, 1::2, :])
        return jnp.einsum("nhwc,oc->nhwo", p, w1x1)

    h = jnp.transpose(x_nchw, (0, 2, 3, 1))
    for dw1, dw2 in raw["level1"]:
        h = block(h, dw1, dw2)
    e1 = h
    h = down(e1, raw["w12"])
    for dw1, dw2 in raw["level2"]:
        h = block(h, dw1, dw2)
    e2 = h
    h = down(e2, raw["w23"])
    for dw1, dw2 in raw["level3"]:
        h = block(h, dw1, dw2)
    e3 = h
    return [jnp.transpose(e, (0, 3, 1, 2)) for e in (e1, e2, e3)]


# -----------------------------------------------------------------------------
if __name__ == "__main__":
    wf, scale, vscale, ksize = 8, 4, 4, 3
    N, H, W = 4, 16, 16
    c1, c2, c3 = wf, wf + scale, wf + scale + vscale

    root = jax.random.PRNGKey(0)
    pkey, xkey = jax.random.split(root)
    params, raw = init_encoder_params(pkey, wf, scale, vscale, ksize, H, W)
    x = jax.random.normal(xkey, (N, c1, H, W), jnp.float32)   # NCHW, like PyTorch

    fwd = jax.jit(functools.partial(encoder_forward, chans=(c1, c2, c3)))
    enc1, enc2, enc3 = fwd(x, params)
    jax.block_until_ready((enc1, enc2, enc3))

    assert enc1.shape == (N, c1, H, W)
    assert enc2.shape == (N, c2, H // 2, W // 2)
    assert enc3.shape == (N, c3, H // 4, W // 4)
    assert all(bool(jnp.isfinite(e).all()) for e in (enc1, enc2, enc3))

    # Cross-check against a plain-JAX f32 reference using the same folded
    # weights (tolerance absorbs the bf16 matmul-operand cast).
    r1, r2, r3 = jax.jit(encoder_reference)(x, raw)
    for got, want in zip((enc1, enc2, enc3), (r1, r2, r3)):
        err = float(jnp.max(jnp.abs(got - want)))
        ref_scale = float(jnp.max(jnp.abs(want))) + 1e-6
        assert err <= 5e-2 * ref_scale, (err, ref_scale)

    print("KERNEL_OK")
</pallas_src>

<mosaic_0001>
module attributes {stable_mosaic.version = 11 : i64} {
  func.func @_encoder_kernel(%arg0: i32, %arg1: memref<1xf32, #tpu.memory_space<smem>>, %arg2: memref<1x32x128xf32, #tpu.memory_space<vmem>>, %arg3: memref<4x384x128xbf16, #tpu.memory_space<vmem>>, %arg4: memref<4x384x128xbf16, #tpu.memory_space<vmem>>, %arg5: memref<4x384x128xbf16, #tpu.memory_space<vmem>>, %arg6: memref<128x128xbf16, #tpu.memory_space<vmem>>, %arg7: memref<128x128xbf16, #tpu.memory_space<vmem>>, %arg8: memref<16x32xbf16, #tpu.memory_space<vmem>>, %arg9: memref<8x16xbf16, #tpu.memory_space<vmem>>, %arg10: memref<1x32x128xf32, #tpu.memory_space<vmem>>, %arg11: memref<1x16x128xf32, #tpu.memory_space<vmem>>, %arg12: memref<1x8x128xf32, #tpu.memory_space<vmem>>) attributes {dimension_semantics = [#tpu.dimension_semantics<parallel>], iteration_bounds = array<i64: 2>, scalar_prefetch = 0 : i64, scratch_operands = 0 : i64, tpu.core_type = #tpu.core_type<tc>, window_params = [{transform_indices = @transform_0, window_bounds = array<i64: 1>}, {transform_indices = @transform_1, window_bounds = array<i64: 1, 32, 128>}, {pipeline_mode = #tpu.pipeline_mode<synchronous>, transform_indices = @transform_2, window_bounds = array<i64: 4, 384, 128>}, {pipeline_mode = #tpu.pipeline_mode<synchronous>, transform_indices = @transform_3, window_bounds = array<i64: 4, 384, 128>}, {pipeline_mode = #tpu.pipeline_mode<synchronous>, transform_indices = @transform_4, window_bounds = array<i64: 4, 384, 128>}, {pipeline_mode = #tpu.pipeline_mode<synchronous>, transform_indices = @transform_5, window_bounds = array<i64: 128, 128>}, {pipeline_mode = #tpu.pipeline_mode<synchronous>, transform_indices = @transform_6, window_bounds = array<i64: 128, 128>}, {pipeline_mode = #tpu.pipeline_mode<synchronous>, transform_indices = @transform_7, window_bounds = array<i64: 16, 32>}, {pipeline_mode = #tpu.pipeline_mode<synchronous>, transform_indices = @transform_8, window_bounds = array<i64: 8, 16>}, {transform_indices = @transform_9, window_bounds = array<i64: 1, 32, 128>}, {transform_indices = @transform_10, window_bounds = array<i64: 1, 16, 128>}, {transform_indices = @transform_11, window_bounds = array<i64: 1, 8, 128>}]} {
    %c0 = arith.constant 0 : index
    %0 = memref.load %arg1[%c0] : memref<1xf32, #tpu.memory_space<smem>>
    %c0_0 = arith.constant 0 : index
    %c0_1 = arith.constant 0 : index
    %c0_2 = arith.constant 0 : index
    %1 = vector.load %arg2[%c0_0, %c0_1, %c0_2] : memref<1x32x128xf32, #tpu.memory_space<vmem>>, vector<1x32x128xf32>
    %2 = vector.shape_cast %1 : vector<1x32x128xf32> to vector<32x128xf32>
    %3 = tpu.iota {dimensions = array<i32: 0>} : vector<32x1xi32>
    %c16_i32 = arith.constant 16 : i32
    %c0_i32 = arith.constant 0 : i32
    %4 = arith.cmpi eq, %c16_i32, %c0_i32 : i32
    %c1_i32 = arith.constant 1 : i32
    %5 = arith.select %4, %c1_i32, %c16_i32 : i32
    %6 = vector.broadcast %5 : i32 to vector<32x1xi32>
    %7 = arith.remsi %3, %6 : vector<32x1xi32>
    %c0_i32_3 = arith.constant 0 : i32
    %8 = vector.broadcast %c0_i32_3 : i32 to vector<32x1xi32>
    %9 = arith.cmpi ne, %7, %8 : vector<32x1xi32>
    %c0_i32_4 = arith.constant 0 : i32
    %10 = vector.broadcast %c0_i32_4 : i32 to vector<32x1xi32>
    %11 = arith.cmpi slt, %7, %10 : vector<32x1xi32>
    %c0_i32_5 = arith.constant 0 : i32
    %12 = arith.cmpi slt, %5, %c0_i32_5 : i32
    %13 = vector.broadcast %12 : i1 to vector<32x1xi1>
    %14 = vector.broadcast %13 : vector<32x1xi1> to vector<32x1xi1>
    %15 = arith.xori %11, %14 : vector<32x1xi1>
    %16 = arith.andi %15, %9 : vector<32x1xi1>
    %17 = vector.broadcast %5 : i32 to vector<32x1xi32>
    %18 = arith.addi %7, %17 : vector<32x1xi32>
    %19 = arith.select %16, %18, %7 : vector<32x1xi1>, vector<32x1xi32>
    %c0_i32_6 = arith.constant 0 : i32
    %20 = vector.broadcast %c0_i32_6 : i32 to vector<32x1xi32>
    %21 = arith.cmpi eq, %19, %20 : vector<32x1xi32>
    %c15_i32 = arith.constant 15 : i32
    %22 = vector.broadcast %c15_i32 : i32 to vector<32x1xi32>
    %23 = arith.cmpi eq, %19, %22 : vector<32x1xi32>
    %c1_i32_7 = arith.constant 1 : i32
    %24 = tpu.dynamic_rotate %2 by %c1_i32_7 dim 0 : vector<32x128xf32>, i32 -> vector<32x128xf32>
    %cst = arith.constant 0.000000e+00 : f32
    %25 = vector.shape_cast %21 : vector<32x1xi1> to vector<32x1xi1>
    %26 = vector.broadcast %25 : vector<32x1xi1> to vector<32x128xi1>
    %27 = vector.broadcast %cst : f32 to vector<32x128xf32>
    %28 = arith.select %26, %27, %24 : vector<32x128xi1>, vector<32x128xf32>
    %c31_i32 = arith.constant 31 : i32
    %29 = tpu.dynamic_rotate %2 by %c31_i32 dim 0 : vector<32x128xf32>, i32 -> vector<32x128xf32>
    %cst_8 = arith.constant 0.000000e+00 : f32
    %30 = vector.shape_cast %23 : vector<32x1xi1> to vector<32x1xi1>
    %31 = vector.broadcast %30 : vector<32x1xi1> to vector<32x128xi1>
    %32 = vector.broadcast %cst_8 : f32 to vector<32x128xf32>
    %33 = arith.select %31, %32, %29 : vector<32x128xi1>, vector<32x128xf32>
    %34 = arith.truncf %28 : vector<32x128xf32> to vector<32x128xbf16>
    %35 = arith.truncf %2 : vector<32x128xf32> to vector<32x128xbf16>
    %36 = arith.truncf %33 : vector<32x128xf32> to vector<32x128xbf16>
    %37 = tpu.concatenate %34, %35, %36 in 1 : vector<32x128xbf16>, vector<32x128xbf16>, vector<32x128xbf16> -> vector<32x384xbf16>
    %c0_9 = arith.constant 0 : index
    %c0_10 = arith.constant 0 : index
    %c0_11 = arith.constant 0 : index
    %38 = vector.load %arg3[%c0_9, %c0_10, %c0_11] : memref<4x384x128xbf16, #tpu.memory_space<vmem>>, vector<1x384x128xbf16>
    %39 = vector.shape_cast %38 : vector<1x384x128xbf16> to vector<384x128xbf16>
    %cst_12 = arith.constant dense<0.000000e+00> : vector<32x128xf32>
    %40 = tpu.matmul %37, %39, %cst_12 {dimension_numbers = #tpu.dot_dimension_numbers<[1], [0], [0], [1], [0, 0, 1, 1], [], []>} : vector<32x384xbf16>, vector<384x128xbf16>, vector<32x128xf32> -> vector<32x128xf32>
    %cst_13 = arith.constant 0.000000e+00 : f32
    %41 = vector.broadcast %cst_13 : f32 to vector<32x128xf32>
    %42 = arith.cmpf oge, %40, %41 : vector<32x128xf32>
    %43 = vector.broadcast %0 : f32 to vector<32x128xf32>
    %44 = arith.mulf %43, %40 : vector<32x128xf32>
    %45 = arith.select %42, %40, %44 : vector<32x128xi1>, vector<32x128xf32>
    %c1_i32_14 = arith.constant 1 : i32
    %46 = tpu.dynamic_rotate %45 by %c1_i32_14 dim 0 : vector<32x128xf32>, i32 -> vector<32x128xf32>
    %cst_15 = arith.constant 0.000000e+00 : f32
    %47 = vector.shape_cast %21 : vector<32x1xi1> to vector<32x1xi1>
    %48 = vector.broadcast %47 : vector<32x1xi1> to vector<32x128xi1>
    %49 = vector.broadcast %cst_15 : f32 to vector<32x128xf32>
    %50 = arith.select %48, %49, %46 : vector<32x128xi1>, vector<32x128xf32>
    %c31_i32_16 = arith.constant 31 : i32
    %51 = tpu.dynamic_rotate %45 by %c31_i32_16 dim 0 : vector<32x128xf32>, i32 -> vector<32x128xf32>
    %cst_17 = arith.constant 0.000000e+00 : f32
    %52 = vector.shape_cast %23 : vector<32x1xi1> to vector<32x1xi1>
    %53 = vector.broadcast %52 : vector<32x1xi1> to vector<32x128xi1>
    %54 = vector.broadcast %cst_17 : f32 to vector<32x128xf32>
    %55 = arith.select %53, %54, %51 : vector<32x128xi1>, vector<32x128xf32>
    %56 = arith.truncf %50 : vector<32x128xf32> to vector<32x128xbf16>
    %57 = arith.truncf %45 : vector<32x128xf32> to vector<32x128xbf16>
    %58 = arith.truncf %55 : vector<32x128xf32> to vector<32x128xbf16>
    %59 = tpu.concatenate %56, %57, %58 in 1 : vector<32x128xbf16>, vector<32x128xbf16>, vector<32x128xbf16> -> vector<32x384xbf16>
    %c1 = arith.constant 1 : index
    %c0_18 = arith.constant 0 : index
    %c0_19 = arith.constant 0 : index
    %60 = vector.load %arg3[%c1, %c0_18, %c0_19] : memref<4x384x128xbf16, #tpu.memory_space<vmem>>, vector<1x384x128xbf16>
    %61 = vector.shape_cast %60 : vector<1x384x128xbf16> to vector<384x128xbf16>
    %cst_20 = arith.constant dense<0.000000e+00> : vector<32x128xf32>
    %62 = tpu.matmul %59, %61, %cst_20 {dimension_numbers = #tpu.dot_dimension_numbers<[1], [0], [0], [1], [0, 0, 1, 1], [], []>} : vector<32x384xbf16>, vector<384x128xbf16>, vector<32x128xf32> -> vector<32x128xf32>
    %63 = arith.addf %2, %62 : vector<32x128xf32>
    %c1_i32_21 = arith.constant 1 : i32
    %64 = tpu.dynamic_rotate %63 by %c1_i32_21 dim 0 : vector<32x128xf32>, i32 -> vector<32x128xf32>
    %cst_22 = arith.constant 0.000000e+00 : f32
    %65 = vector.shape_cast %21 : vector<32x1xi1> to vector<32x1xi1>
    %66 = vector.broadcast %65 : vector<32x1xi1> to vector<32x128xi1>
    %67 = vector.broadcast %cst_22 : f32 to vector<32x128xf32>
    %68 = arith.select %66, %67, %64 : vector<32x128xi1>, vector<32x128xf32>
    %c31_i32_23 = arith.constant 31 : i32
    %69 = tpu.dynamic_rotate %63 by %c31_i32_23 dim 0 : vector<32x128xf32>, i32 -> vector<32x128xf32>
    %cst_24 = arith.constant 0.000000e+00 : f32
    %70 = vector.shape_cast %23 : vector<32x1xi1> to vector<32x1xi1>
    %71 = vector.broadcast %70 : vector<32x1xi1> to vector<32x128xi1>
    %72 = vector.broadcast %cst_24 : f32 to vector<32x128xf32>
    %73 = arith.select %71, %72, %69 : vector<32x128xi1>, vector<32x128xf32>
    %74 = arith.truncf %68 : vector<32x128xf32> to vector<32x128xbf16>
    %75 = arith.truncf %63 : vector<32x128xf32> to vector<32x128xbf16>
    %76 = arith.truncf %73 : vector<32x128xf32> to vector<32x128xbf16>
    %77 = tpu.concatenate %74, %75, %76 in 1 : vector<32x128xbf16>, vector<32x128xbf16>, vector<32x128xbf16> -> vector<32x384xbf16>
    %c2 = arith.constant 2 : index
    %c0_25 = arith.constant 0 : index
    %c0_26 = arith.constant 0 : index
    %78 = vector.load %arg3[%c2, %c0_25, %c0_26] : memref<4x384x128xbf16, #tpu.memory_space<vmem>>, vector<1x384x128xbf16>
    %79 = vector.shape_cast %78 : vector<1x384x128xbf16> to vector<384x128xbf16>
    %cst_27 = arith.constant dense<0.000000e+00> : vector<32x128xf32>
    %80 = tpu.matmul %77, %79, %cst_27 {dimension_numbers = #tpu.dot_dimension_numbers<[1], [0], [0], [1], [0, 0, 1, 1], [], []>} : vector<32x384xbf16>, vector<384x128xbf16>, vector<32x128xf32> -> vector<32x128xf32>
    %cst_28 = arith.constant 0.000000e+00 : f32
    %81 = vector.broadcast %cst_28 : f32 to vector<32x128xf32>
    %82 = arith.cmpf oge, %80, %81 : vector<32x128xf32>
    %83 = vector.broadcast %0 : f32 to vector<32x128xf32>
    %84 = arith.mulf %83, %80 : vector<32x128xf32>
    %85 = arith.select %82, %80, %84 : vector<32x128xi1>, vector<32x128xf32>
    %c1_i32_29 = arith.constant 1 : i32
    %86 = tpu.dynamic_rotate %85 by %c1_i32_29 dim 0 : vector<32x128xf32>, i32 -> vector<32x128xf32>
    %cst_30 = arith.constant 0.000000e+00 : f32
    %87 = vector.shape_cast %21 : vector<32x1xi1> to vector<32x1xi1>
    %88 = vector.broadcast %87 : vector<32x1xi1> to vector<32x128xi1>
    %89 = vector.broadcast %cst_30 : f32 to vector<32x128xf32>
    %90 = arith.select %88, %89, %86 : vector<32x128xi1>, vector<32x128xf32>
    %c31_i32_31 = arith.constant 31 : i32
    %91 = tpu.dynamic_rotate %85 by %c31_i32_31 dim 0 : vector<32x128xf32>, i32 -> vector<32x128xf32>
    %cst_32 = arith.constant 0.000000e+00 : f32
    %92 = vector.shape_cast %23 : vector<32x1xi1> to vector<32x1xi1>
    %93 = vector.broadcast %92 : vector<32x1xi1> to vector<32x128xi1>
    %94 = vector.broadcast %cst_32 : f32 to vector<32x128xf32>
    %95 = arith.select %93, %94, %91 : vector<32x128xi1>, vector<32x128xf32>
    %96 = arith.truncf %90 : vector<32x128xf32> to vector<32x128xbf16>
    %97 = arith.truncf %85 : vector<32x128xf32> to vector<32x128xbf16>
    %98 = arith.truncf %95 : vector<32x128xf32> to vector<32x128xbf16>
    %99 = tpu.concatenate %96, %97, %98 in 1 : vector<32x128xbf16>, vector<32x128xbf16>, vector<32x128xbf16> -> vector<32x384xbf16>
    %c3 = arith.constant 3 : index
    %c0_33 = arith.constant 0 : index
    %c0_34 = arith.constant 0 : index
    %100 = vector.load %arg3[%c3, %c0_33, %c0_34] : memref<4x384x128xbf16, #tpu.memory_space<vmem>>, vector<1x384x128xbf16>
    %101 = vector.shape_cast %100 : vector<1x384x128xbf16> to vector<384x128xbf16>
    %cst_35 = arith.constant dense<0.000000e+00> : vector<32x128xf32>
    %102 = tpu.matmul %99, %101, %cst_35 {dimension_numbers = #tpu.dot_dimension_numbers<[1], [0], [0], [1], [0, 0, 1, 1], [], []>} : vector<32x384xbf16>, vector<384x128xbf16>, vector<32x128xf32> -> vector<32x128xf32>
    %103 = arith.addf %63, %102 : vector<32x128xf32>
    %c0_36 = arith.constant 0 : index
    %c0_37 = arith.constant 0 : index
    %c0_38 = arith.constant 0 : index
    %104 = vector.load %arg10[%c0_36, %c0_37, %c0_38] : memref<1x32x128xf32, #tpu.memory_space<vmem>>, vector<1x32x128xf32>
    %105 = vector.shape_cast %104 : vector<1x32x128xf32> to vector<32x128xf32>
    %106 = vector.shape_cast %103 : vector<32x128xf32> to vector<1x32x128xf32>
    tpu.vector_store %arg10[%c0_36, %c0_37, %c0_38], %106 {strides = array<i32>} : memref<1x32x128xf32, #tpu.memory_space<vmem>>, vector<1x32x128xf32>,
    %c0_39 = arith.constant 0 : index
    %c0_40 = arith.constant 0 : index
    %107 = vector.load %arg8[%c0_39, %c0_40] : memref<16x32xbf16, #tpu.memory_space<vmem>>, vector<16x32xbf16>
    %108 = arith.truncf %103 : vector<32x128xf32> to vector<32x128xbf16>
    %cst_41 = arith.constant dense<0.000000e+00> : vector<16x128xf32>
    %109 = tpu.matmul %107, %108, %cst_41 {dimension_numbers = #tpu.dot_dimension_numbers<[1], [0], [0], [1], [0, 0, 1, 1], [], []>} : vector<16x32xbf16>, vector<32x128xbf16>, vector<16x128xf32> -> vector<16x128xf32>
    %110 = arith.truncf %109 : vector<16x128xf32> to vector<16x128xbf16>
    %c0_42 = arith.constant 0 : index
    %c0_43 = arith.constant 0 : index
    %111 = vector.load %arg6[%c0_42, %c0_43] : memref<128x128xbf16, #tpu.memory_space<vmem>>, vector<128x128xbf16>
    %cst_44 = arith.constant dense<0.000000e+00> : vector<16x128xf32>
    %112 = tpu.matmul %110, %111, %cst_44 {dimension_numbers = #tpu.dot_dimension_numbers<[1], [0], [0], [1], [0, 0, 1, 1], [], []>} : vector<16x128xbf16>, vector<128x128xbf16>, vector<16x128xf32> -> vector<16x128xf32>
    %113 = tpu.iota {dimensions = array<i32: 0>} : vector<16x1xi32>
    %c8_i32 = arith.constant 8 : i32
    %c0_i32_45 = arith.constant 0 : i32
    %114 = arith.cmpi eq, %c8_i32, %c0_i32_45 : i32
    %c1_i32_46 = arith.constant 1 : i32
    %115 = arith.select %114, %c1_i32_46, %c8_i32 : i32
    %116 = vector.broadcast %115 : i32 to vector<16x1xi32>
    %117 = arith.remsi %113, %116 : vector<16x1xi32>
    %c0_i32_47 = arith.constant 0 : i32
    %118 = vector.broadcast %c0_i32_47 : i32 to vector<16x1xi32>
    %119 = arith.cmpi ne, %117, %118 : vector<16x1xi32>
    %c0_i32_48 = arith.constant 0 : i32
    %120 = vector.broadcast %c0_i32_48 : i32 to vector<16x1xi32>
    %121 = arith.cmpi slt, %117, %120 : vector<16x1xi32>
    %c0_i32_49 = arith.constant 0 : i32
    %122 = arith.cmpi slt, %115, %c0_i32_49 : i32
    %123 = vector.broadcast %122 : i1 to vector<16x1xi1>
    %124 = vector.broadcast %123 : vector<16x1xi1> to vector<16x1xi1>
    %125 = arith.xori %121, %124 : vector<16x1xi1>
    %126 = arith.andi %125, %119 : vector<16x1xi1>
    %127 = vector.broadcast %115 : i32 to vector<16x1xi32>
    %128 = arith.addi %117, %127 : vector<16x1xi32>
    %129 = arith.select %126, %128, %117 : vector<16x1xi1>, vector<16x1xi32>
    %c0_i32_50 = arith.constant 0 : i32
    %130 = vector.broadcast %c0_i32_50 : i32 to vector<16x1xi32>
    %131 = arith.cmpi eq, %129, %130 : vector<16x1xi32>
    %c7_i32 = arith.constant 7 : i32
    %132 = vector.broadcast %c7_i32 : i32 to vector<16x1xi32>
    %133 = arith.cmpi eq, %129, %132 : vector<16x1xi32>
    %c1_i32_51 = arith.constant 1 : i32
    %134 = tpu.dynamic_rotate %112 by %c1_i32_51 dim 0 : vector<16x128xf32>, i32 -> vector<16x128xf32>
    %cst_52 = arith.constant 0.000000e+00 : f32
    %135 = vector.shape_cast %131 : vector<16x1xi1> to vector<16x1xi1>
    %136 = vector.broadcast %135 : vector<16x1xi1> to vector<16x128xi1>
    %137 = vector.broadcast %cst_52 : f32 to vector<16x128xf32>
    %138 = arith.select %136, %137, %134 : vector<16x128xi1>, vector<16x128xf32>
    %c15_i32_53 = arith.constant 15 : i32
    %139 = tpu.dynamic_rotate %112 by %c15_i32_53 dim 0 : vector<16x128xf32>, i32 -> vector<16x128xf32>
    %cst_54 = arith.constant 0.000000e+00 : f32
    %140 = vector.shape_cast %133 : vector<16x1xi1> to vector<16x1xi1>
    %141 = vector.broadcast %140 : vector<16x1xi1> to vector<16x128xi1>
    %142 = vector.broadcast %cst_54 : f32 to vector<16x128xf32>
    %143 = arith.select %141, %142, %139 : vector<16x128xi1>, vector<16x128xf32>
    %144 = arith.truncf %138 : vector<16x128xf32> to vector<16x128xbf16>
    %145 = arith.truncf %112 : vector<16x128xf32> to vector<16x128xbf16>
    %146 = arith.truncf %143 : vector<16x128xf32> to vector<16x128xbf16>
    %147 = tpu.concatenate %144, %145, %146 in 1 : vector<16x128xbf16>, vector<16x128xbf16>, vector<16x128xbf16> -> vector<16x384xbf16>
    %c0_55 = arith.constant 0 : index
    %c0_56 = arith.constant 0 : index
    %c0_57 = arith.constant 0 : index
    %148 = vector.load %arg4[%c0_55, %c0_56, %c0_57] : memref<4x384x128xbf16, #tpu.memory_space<vmem>>, vector<1x384x128xbf16>
    %149 = vector.shape_cast %148 : vector<1x384x128xbf16> to vector<384x128xbf16>
    %cst_58 = arith.constant dense<0.000000e+00> : vector<16x128xf32>
    %150 = tpu.matmul %147, %149, %cst_58 {dimension_numbers = #tpu.dot_dimension_numbers<[1], [0], [0], [1], [0, 0, 1, 1], [], []>} : vector<16x384xbf16>, vector<384x128xbf16>, vector<16x128xf32> -> vector<16x128xf32>
    %cst_59 = arith.constant 0.000000e+00 : f32
    %151 = vector.broadcast %cst_59 : f32 to vector<16x128xf32>
    %152 = arith.cmpf oge, %150, %151 : vector<16x128xf32>
    %153 = vector.broadcast %0 : f32 to vector<16x128xf32>
    %154 = arith.mulf %153, %150 : vector<16x128xf32>
    %155 = arith.select %152, %150, %154 : vector<16x128xi1>, vector<16x128xf32>
    %c1_i32_60 = arith.constant 1 : i32
    %156 = tpu.dynamic_rotate %155 by %c1_i32_60 dim 0 : vector<16x128xf32>, i32 -> vector<16x128xf32>
    %cst_61 = arith.constant 0.000000e+00 : f32
    %157 = vector.shape_cast %131 : vector<16x1xi1> to vector<16x1xi1>
    %158 = vector.broadcast %157 : vector<16x1xi1> to vector<16x128xi1>
    %159 = vector.broadcast %cst_61 : f32 to vector<16x128xf32>
    %160 = arith.select %158, %159, %156 : vector<16x128xi1>, vector<16x128xf32>
    %c15_i32_62 = arith.constant 15 : i32
    %161 = tpu.dynamic_rotate %155 by %c15_i32_62 dim 0 : vector<16x128xf32>, i32 -> vector<16x128xf32>
    %cst_63 = arith.constant 0.000000e+00 : f32
    %162 = vector.shape_cast %133 : vector<16x1xi1> to vector<16x1xi1>
    %163 = vector.broadcast %162 : vector<16x1xi1> to vector<16x128xi1>
    %164 = vector.broadcast %cst_63 : f32 to vector<16x128xf32>
    %165 = arith.select %163, %164, %161 : vector<16x128xi1>, vector<16x128xf32>
    %166 = arith.truncf %160 : vector<16x128xf32> to vector<16x128xbf16>
    %167 = arith.truncf %155 : vector<16x128xf32> to vector<16x128xbf16>
    %168 = arith.truncf %165 : vector<16x128xf32> to vector<16x128xbf16>
    %169 = tpu.concatenate %166, %167, %168 in 1 : vector<16x128xbf16>, vector<16x128xbf16>, vector<16x128xbf16> -> vector<16x384xbf16>
    %c1_64 = arith.constant 1 : index
    %c0_65 = arith.constant 0 : index
    %c0_66 = arith.constant 0 : index
    %170 = vector.load %arg4[%c1_64, %c0_65, %c0_66] : memref<4x384x128xbf16, #tpu.memory_space<vmem>>, vector<1x384x128xbf16>
    %171 = vector.shape_cast %170 : vector<1x384x128xbf16> to vector<384x128xbf16>
    %cst_67 = arith.constant dense<0.000000e+00> : vector<16x128xf32>
    %172 = tpu.matmul %169, %171, %cst_67 {dimension_numbers = #tpu.dot_dimension_numbers<[1], [0], [0], [1], [0, 0, 1, 1], [], []>} : vector<16x384xbf16>, vector<384x128xbf16>, vector<16x128xf32> -> vector<16x128xf32>
    %173 = arith.addf %112, %172 : vector<16x128xf32>
    %c1_i32_68 = arith.constant 1 : i32
    %174 = tpu.dynamic_rotate %173 by %c1_i32_68 dim 0 : vector<16x128xf32>, i32 -> vector<16x128xf32>
    %cst_69 = arith.constant 0.000000e+00 : f32
    %175 = vector.shape_cast %131 : vector<16x1xi1> to vector<16x1xi1>
    %176 = vector.broadcast %175 : vector<16x1xi1> to vector<16x128xi1>
    %177 = vector.broadcast %cst_69 : f32 to vector<16x128xf32>
    %178 = arith.select %176, %177, %174 : vector<16x128xi1>, vector<16x128xf32>
    %c15_i32_70 = arith.constant 15 : i32
    %179 = tpu.dynamic_rotate %173 by %c15_i32_70 dim 0 : vector<16x128xf32>, i32 -> vector<16x128xf32>
    %cst_71 = arith.constant 0.000000e+00 : f32
    %180 = vector.shape_cast %133 : vector<16x1xi1> to vector<16x1xi1>
    %181 = vector.broadcast %180 : vector<16x1xi1> to vector<16x128xi1>
    %182 = vector.broadcast %cst_71 : f32 to vector<16x128xf32>
    %183 = arith.select %181, %182, %179 : vector<16x128xi1>, vector<16x128xf32>
    %184 = arith.truncf %178 : vector<16x128xf32> to vector<16x128xbf16>
    %185 = arith.truncf %173 : vector<16x128xf32> to vector<16x128xbf16>
    %186 = arith.truncf %183 : vector<16x128xf32> to vector<16x128xbf16>
    %187 = tpu.concatenate %184, %185, %186 in 1 : vector<16x128xbf16>, vector<16x128xbf16>, vector<16x128xbf16> -> vector<16x384xbf16>
    %c2_72 = arith.constant 2 : index
    %c0_73 = arith.constant 0 : index
    %c0_74 = arith.constant 0 : index
    %188 = vector.load %arg4[%c2_72, %c0_73, %c0_74] : memref<4x384x128xbf16, #tpu.memory_space<vmem>>, vector<1x384x128xbf16>
    %189 = vector.shape_cast %188 : vector<1x384x128xbf16> to vector<384x128xbf16>
    %cst_75 = arith.constant dense<0.000000e+00> : vector<16x128xf32>
    %190 = tpu.matmul %187, %189, %cst_75 {dimension_numbers = #tpu.dot_dimension_numbers<[1], [0], [0], [1], [0, 0, 1, 1], [], []>} : vector<16x384xbf16>, vector<384x128xbf16>, vector<16x128xf32> -> vector<16x128xf32>
    %cst_76 = arith.constant 0.000000e+00 : f32
    %191 = vector.broadcast %cst_76 : f32 to vector<16x128xf32>
    %192 = arith.cmpf oge, %190, %191 : vector<16x128xf32>
    %193 = vector.broadcast %0 : f32 to vector<16x128xf32>
    %194 = arith.mulf %193, %190 : vector<16x128xf32>
    %195 = arith.select %192, %190, %194 : vector<16x128xi1>, vector<16x128xf32>
    %c1_i32_77 = arith.constant 1 : i32
    %196 = tpu.dynamic_rotate %195 by %c1_i32_77 dim 0 : vector<16x128xf32>, i32 -> vector<16x128xf32>
    %cst_78 = arith.constant 0.000000e+00 : f32
    %197 = vector.shape_cast %131 : vector<16x1xi1> to vector<16x1xi1>
    %198 = vector.broadcast %197 : vector<16x1xi1> to vector<16x128xi1>
    %199 = vector.broadcast %cst_78 : f32 to vector<16x128xf32>
    %200 = arith.select %198, %199, %196 : vector<16x128xi1>, vector<16x128xf32>
    %c15_i32_79 = arith.constant 15 : i32
    %201 = tpu.dynamic_rotate %195 by %c15_i32_79 dim 0 : vector<16x128xf32>, i32 -> vector<16x128xf32>
    %cst_80 = arith.constant 0.000000e+00 : f32
    %202 = vector.shape_cast %133 : vector<16x1xi1> to vector<16x1xi1>
    %203 = vector.broadcast %202 : vector<16x1xi1> to vector<16x128xi1>
    %204 = vector.broadcast %cst_80 : f32 to vector<16x128xf32>
    %205 = arith.select %203, %204, %201 : vector<16x128xi1>, vector<16x128xf32>
    %206 = arith.truncf %200 : vector<16x128xf32> to vector<16x128xbf16>
    %207 = arith.truncf %195 : vector<16x128xf32> to vector<16x128xbf16>
    %208 = arith.truncf %205 : vector<16x128xf32> to vector<16x128xbf16>
    %209 = tpu.concatenate %206, %207, %208 in 1 : vector<16x128xbf16>, vector<16x128xbf16>, vector<16x128xbf16> -> vector<16x384xbf16>
    %c3_81 = arith.constant 3 : index
    %c0_82 = arith.constant 0 : index
    %c0_83 = arith.constant 0 : index
    %210 = vector.load %arg4[%c3_81, %c0_82, %c0_83] : memref<4x384x128xbf16, #tpu.memory_space<vmem>>, vector<1x384x128xbf16>
    %211 = vector.shape_cast %210 : vector<1x384x128xbf16> to vector<384x128xbf16>
    %cst_84 = arith.constant dense<0.000000e+00> : vector<16x128xf32>
    %212 = tpu.matmul %209, %211, %cst_84 {dimension_numbers = #tpu.dot_dimension_numbers<[1], [0], [0], [1], [0, 0, 1, 1], [], []>} : vector<16x384xbf16>, vector<384x128xbf16>, vector<16x128xf32> -> vector<16x128xf32>
    %213 = arith.addf %173, %212 : vector<16x128xf32>
    %c0_85 = arith.constant 0 : index
    %c0_86 = arith.constant 0 : index
    %c0_87 = arith.constant 0 : index
    %214 = vector.load %arg11[%c0_85, %c0_86, %c0_87] : memref<1x16x128xf32, #tpu.memory_space<vmem>>, vector<1x16x128xf32>
    %215 = vector.shape_cast %214 : vector<1x16x128xf32> to vector<16x128xf32>
    %216 = vector.shape_cast %213 : vector<16x128xf32> to vector<1x16x128xf32>
    tpu.vector_store %arg11[%c0_85, %c0_86, %c0_87], %216 {strides = array<i32>} : memref<1x16x128xf32, #tpu.memory_space<vmem>>, vector<1x16x128xf32>,
    %c0_88 = arith.constant 0 : index
    %c0_89 = arith.constant 0 : index
    %217 = vector.load %arg9[%c0_88, %c0_89] : memref<8x16xbf16, #tpu.memory_space<vmem>>, vector<8x16xbf16>
    %218 = arith.truncf %213 : vector<16x128xf32> to vector<16x128xbf16>
    %cst_90 = arith.constant dense<0.000000e+00> : vector<8x128xf32>
    %219 = tpu.matmul %217, %218, %cst_90 {dimension_numbers = #tpu.dot_dimension_numbers<[1], [0], [0], [1], [0, 0, 1, 1], [], []>} : vector<8x16xbf16>, vector<16x128xbf16>, vector<8x128xf32> -> vector<8x128xf32>
    %220 = arith.truncf %219 : vector<8x128xf32> to vector<8x128xbf16>
    %c0_91 = arith.constant 0 : index
    %c0_92 = arith.constant 0 : index
    %221 = vector.load %arg7[%c0_91, %c0_92] : memref<128x128xbf16, #tpu.memory_space<vmem>>, vector<128x128xbf16>
    %cst_93 = arith.constant dense<0.000000e+00> : vector<8x128xf32>
    %222 = tpu.matmul %220, %221, %cst_93 {dimension_numbers = #tpu.dot_dimension_numbers<[1], [0], [0], [1], [0, 0, 1, 1], [], []>} : vector<8x128xbf16>, vector<128x128xbf16>, vector<8x128xf32> -> vector<8x128xf32>
    %223 = tpu.iota {dimensions = array<i32: 0>} : vector<8x1xi32>
    %c4_i32 = arith.constant 4 : i32
    %c0_i32_94 = arith.constant 0 : i32
    %224 = arith.cmpi eq, %c4_i32, %c0_i32_94 : i32
    %c1_i32_95 = arith.constant 1 : i32
    %225 = arith.select %224, %c1_i32_95, %c4_i32 : i32
    %226 = vector.broadcast %225 : i32 to vector<8x1xi32>
    %227 = arith.remsi %223, %226 : vector<8x1xi32>
    %c0_i32_96 = arith.constant 0 : i32
    %228 = vector.broadcast %c0_i32_96 : i32 to vector<8x1xi32>
    %229 = arith.cmpi ne, %227, %228 : vector<8x1xi32>
    %c0_i32_97 = arith.constant 0 : i32
    %230 = vector.broadcast %c0_i32_97 : i32 to vector<8x1xi32>
    %231 = arith.cmpi slt, %227, %230 : vector<8x1xi32>
    %c0_i32_98 = arith.constant 0 : i32
    %232 = arith.cmpi slt, %225, %c0_i32_98 : i32
    %233 = vector.broadcast %232 : i1 to vector<8x1xi1>
    %234 = vector.broadcast %233 : vector<8x1xi1> to vector<8x1xi1>
    %235 = arith.xori %231, %234 : vector<8x1xi1>
    %236 = arith.andi %235, %229 : vector<8x1xi1>
    %237 = vector.broadcast %225 : i32 to vector<8x1xi32>
    %238 = arith.addi %227, %237 : vector<8x1xi32>
    %239 = arith.select %236, %238, %227 : vector<8x1xi1>, vector<8x1xi32>
    %c0_i32_99 = arith.constant 0 : i32
    %240 = vector.broadcast %c0_i32_99 : i32 to vector<8x1xi32>
    %241 = arith.cmpi eq, %239, %240 : vector<8x1xi32>
    %c3_i32 = arith.constant 3 : i32
    %242 = vector.broadcast %c3_i32 : i32 to vector<8x1xi32>
    %243 = arith.cmpi eq, %239, %242 : vector<8x1xi32>
    %c1_i32_100 = arith.constant 1 : i32
    %244 = tpu.dynamic_rotate %222 by %c1_i32_100 dim 0 : vector<8x128xf32>, i32 -> vector<8x128xf32>
    %cst_101 = arith.constant 0.000000e+00 : f32
    %245 = vector.shape_cast %241 : vector<8x1xi1> to vector<8x1xi1>
    %246 = vector.broadcast %245 : vector<8x1xi1> to vector<8x128xi1>
    %247 = vector.broadcast %cst_101 : f32 to vector<8x128xf32>
    %248 = arith.select %246, %247, %244 : vector<8x128xi1>, vector<8x128xf32>
    %c7_i32_102 = arith.constant 7 : i32
    %249 = tpu.dynamic_rotate %222 by %c7_i32_102 dim 0 : vector<8x128xf32>, i32 -> vector<8x128xf32>
    %cst_103 = arith.constant 0.000000e+00 : f32
    %250 = vector.shape_cast %243 : vector<8x1xi1> to vector<8x1xi1>
    %251 = vector.broadcast %250 : vector<8x1xi1> to vector<8x128xi1>
    %252 = vector.broadcast %cst_103 : f32 to vector<8x128xf32>
    %253 = arith.select %251, %252, %249 : vector<8x128xi1>, vector<8x128xf32>
    %254 = arith.truncf %248 : vector<8x128xf32> to vector<8x128xbf16>
    %255 = arith.truncf %222 : vector<8x128xf32> to vector<8x128xbf16>
    %256 = arith.truncf %253 : vector<8x128xf32> to vector<8x128xbf16>
    %257 = tpu.concatenate %254, %255, %256 in 1 : vector<8x128xbf16>, vector<8x128xbf16>, vector<8x128xbf16> -> vector<8x384xbf16>
    %c0_104 = arith.constant 0 : index
    %c0_105 = arith.constant 0 : index
    %c0_106 = arith.constant 0 : index
    %258 = vector.load %arg5[%c0_104, %c0_105, %c0_106] : memref<4x384x128xbf16, #tpu.memory_space<vmem>>, vector<1x384x128xbf16>
    %259 = vector.shape_cast %258 : vector<1x384x128xbf16> to vector<384x128xbf16>
    %cst_107 = arith.constant dense<0.000000e+00> : vector<8x128xf32>
    %260 = tpu.matmul %257, %259, %cst_107 {dimension_numbers = #tpu.dot_dimension_numbers<[1], [0], [0], [1], [0, 0, 1, 1], [], []>} : vector<8x384xbf16>, vector<384x128xbf16>, vector<8x128xf32> -> vector<8x128xf32>
    %cst_108 = arith.constant 0.000000e+00 : f32
    %261 = vector.broadcast %cst_108 : f32 to vector<8x128xf32>
    %262 = arith.cmpf oge, %260, %261 : vector<8x128xf32>
    %263 = vector.broadcast %0 : f32 to vector<8x128xf32>
    %264 = arith.mulf %263, %260 : vector<8x128xf32>
    %265 = arith.select %262, %260, %264 : vector<8x128xi1>, vector<8x128xf32>
    %c1_i32_109 = arith.constant 1 : i32
    %266 = tpu.dynamic_rotate %265 by %c1_i32_109 dim 0 : vector<8x128xf32>, i32 -> vector<8x128xf32>
    %cst_110 = arith.constant 0.000000e+00 : f32
    %267 = vector.shape_cast %241 : vector<8x1xi1> to vector<8x1xi1>
    %268 = vector.broadcast %267 : vector<8x1xi1> to vector<8x128xi1>
    %269 = vector.broadcast %cst_110 : f32 to vector<8x128xf32>
    %270 = arith.select %268, %269, %266 : vector<8x128xi1>, vector<8x128xf32>
    %c7_i32_111 = arith.constant 7 : i32
    %271 = tpu.dynamic_rotate %265 by %c7_i32_111 dim 0 : vector<8x128xf32>, i32 -> vector<8x128xf32>
    %cst_112 = arith.constant 0.000000e+00 : f32
    %272 = vector.shape_cast %243 : vector<8x1xi1> to vector<8x1xi1>
    %273 = vector.broadcast %272 : vector<8x1xi1> to vector<8x128xi1>
    %274 = vector.broadcast %cst_112 : f32 to vector<8x128xf32>
    %275 = arith.select %273, %274, %271 : vector<8x128xi1>, vector<8x128xf32>
    %276 = arith.truncf %270 : vector<8x128xf32> to vector<8x128xbf16>
    %277 = arith.truncf %265 : vector<8x128xf32> to vector<8x128xbf16>
    %278 = arith.truncf %275 : vector<8x128xf32> to vector<8x128xbf16>
    %279 = tpu.concatenate %276, %277, %278 in 1 : vector<8x128xbf16>, vector<8x128xbf16>, vector<8x128xbf16> -> vector<8x384xbf16>
    %c1_113 = arith.constant 1 : index
    %c0_114 = arith.constant 0 : index
    %c0_115 = arith.constant 0 : index
    %280 = vector.load %arg5[%c1_113, %c0_114, %c0_115] : memref<4x384x128xbf16, #tpu.memory_space<vmem>>, vector<1x384x128xbf16>
    %281 = vector.shape_cast %280 : vector<1x384x128xbf16> to vector<384x128xbf16>
    %cst_116 = arith.constant dense<0.000000e+00> : vector<8x128xf32>
    %282 = tpu.matmul %279, %281, %cst_116 {dimension_numbers = #tpu.dot_dimension_numbers<[1], [0], [0], [1], [0, 0, 1, 1], [], []>} : vector<8x384xbf16>, vector<384x128xbf16>, vector<8x128xf32> -> vector<8x128xf32>
    %283 = arith.addf %222, %282 : vector<8x128xf32>
    %c1_i32_117 = arith.constant 1 : i32
    %284 = tpu.dynamic_rotate %283 by %c1_i32_117 dim 0 : vector<8x128xf32>, i32 -> vector<8x128xf32>
    %cst_118 = arith.constant 0.000000e+00 : f32
    %285 = vector.shape_cast %241 : vector<8x1xi1> to vector<8x1xi1>
    %286 = vector.broadcast %285 : vector<8x1xi1> to vector<8x128xi1>
    %287 = vector.broadcast %cst_118 : f32 to vector<8x128xf32>
    %288 = arith.select %286, %287, %284 : vector<8x128xi1>, vector<8x128xf32>
    %c7_i32_119 = arith.constant 7 : i32
    %289 = tpu.dynamic_rotate %283 by %c7_i32_119 dim 0 : vector<8x128xf32>, i32 -> vector<8x128xf32>
    %cst_120 = arith.constant 0.000000e+00 : f32
    %290 = vector.shape_cast %243 : vector<8x1xi1> to vector<8x1xi1>
    %291 = vector.broadcast %290 : vector<8x1xi1> to vector<8x128xi1>
    %292 = vector.broadcast %cst_120 : f32 to vector<8x128xf32>
    %293 = arith.select %291, %292, %289 : vector<8x128xi1>, vector<8x128xf32>
    %294 = arith.truncf %288 : vector<8x128xf32> to vector<8x128xbf16>
    %295 = arith.truncf %283 : vector<8x128xf32> to vector<8x128xbf16>
    %296 = arith.truncf %293 : vector<8x128xf32> to vector<8x128xbf16>
    %297 = tpu.concatenate %294, %295, %296 in 1 : vector<8x128xbf16>, vector<8x128xbf16>, vector<8x128xbf16> -> vector<8x384xbf16>
    %c2_121 = arith.constant 2 : index
    %c0_122 = arith.constant 0 : index
    %c0_123 = arith.constant 0 : index
    %298 = vector.load %arg5[%c2_121, %c0_122, %c0_123] : memref<4x384x128xbf16, #tpu.memory_space<vmem>>, vector<1x384x128xbf16>
    %299 = vector.shape_cast %298 : vector<1x384x128xbf16> to vector<384x128xbf16>
    %cst_124 = arith.constant dense<0.000000e+00> : vector<8x128xf32>
    %300 = tpu.matmul %297, %299, %cst_124 {dimension_numbers = #tpu.dot_dimension_numbers<[1], [0], [0], [1], [0, 0, 1, 1], [], []>} : vector<8x384xbf16>, vector<384x128xbf16>, vector<8x128xf32> -> vector<8x128xf32>
    %cst_125 = arith.constant 0.000000e+00 : f32
    %301 = vector.broadcast %cst_125 : f32 to vector<8x128xf32>
    %302 = arith.cmpf oge, %300, %301 : vector<8x128xf32>
    %303 = vector.broadcast %0 : f32 to vector<8x128xf32>
    %304 = arith.mulf %303, %300 : vector<8x128xf32>
    %305 = arith.select %302, %300, %304 : vector<8x128xi1>, vector<8x128xf32>
    %c1_i32_126 = arith.constant 1 : i32
    %306 = tpu.dynamic_rotate %305 by %c1_i32_126 dim 0 : vector<8x128xf32>, i32 -> vector<8x128xf32>
    %cst_127 = arith.constant 0.000000e+00 : f32
    %307 = vector.shape_cast %241 : vector<8x1xi1> to vector<8x1xi1>
    %308 = vector.broadcast %307 : vector<8x1xi1> to vector<8x128xi1>
    %309 = vector.broadcast %cst_127 : f32 to vector<8x128xf32>
    %310 = arith.select %308, %309, %306 : vector<8x128xi1>, vector<8x128xf32>
    %c7_i32_128 = arith.constant 7 : i32
    %311 = tpu.dynamic_rotate %305 by %c7_i32_128 dim 0 : vector<8x128xf32>, i32 -> vector<8x128xf32>
    %cst_129 = arith.constant 0.000000e+00 : f32
    %312 = vector.shape_cast %243 : vector<8x1xi1> to vector<8x1xi1>
    %313 = vector.broadcast %312 : vector<8x1xi1> to vector<8x128xi1>
    %314 = vector.broadcast %cst_129 : f32 to vector<8x128xf32>
    %315 = arith.select %313, %314, %311 : vector<8x128xi1>, vector<8x128xf32>
    %316 = arith.truncf %310 : vector<8x128xf32> to vector<8x128xbf16>
    %317 = arith.truncf %305 : vector<8x128xf32> to vector<8x128xbf16>
    %318 = arith.truncf %315 : vector<8x128xf32> to vector<8x128xbf16>
    %319 = tpu.concatenate %316, %317, %318 in 1 : vector<8x128xbf16>, vector<8x128xbf16>, vector<8x128xbf16> -> vector<8x384xbf16>
    %c3_130 = arith.constant 3 : index
    %c0_131 = arith.constant 0 : index
    %c0_132 = arith.constant 0 : index
    %320 = vector.load %arg5[%c3_130, %c0_131, %c0_132] : memref<4x384x128xbf16, #tpu.memory_space<vmem>>, vector<1x384x128xbf16>
    %321 = vector.shape_cast %320 : vector<1x384x128xbf16> to vector<384x128xbf16>
    %cst_133 = arith.constant dense<0.000000e+00> : vector<8x128xf32>
    %322 = tpu.matmul %319, %321, %cst_133 {dimension_numbers = #tpu.dot_dimension_numbers<[1], [0], [0], [1], [0, 0, 1, 1], [], []>} : vector<8x384xbf16>, vector<384x128xbf16>, vector<8x128xf32> -> vector<8x128xf32>
    %323 = arith.addf %283, %322 : vector<8x128xf32>
    %c0_134 = arith.constant 0 : index
    %c0_135 = arith.constant 0 : index
    %c0_136 = arith.constant 0 : index
    %324 = vector.load %arg12[%c0_134, %c0_135, %c0_136] : memref<1x8x128xf32, #tpu.memory_space<vmem>>, vector<1x8x128xf32>
    %325 = vector.shape_cast %324 : vector<1x8x128xf32> to vector<8x128xf32>
    %326 = vector.shape_cast %323 : vector<8x128xf32> to vector<1x8x128xf32>
    tpu.vector_store %arg12[%c0_134, %c0_135, %c0_136], %326 {strides = array<i32>} : memref<1x8x128xf32, #tpu.memory_space<vmem>>, vector<1x8x128xf32>,
    return
  }
  func.func @transform_0(%arg0: i32) -> i32 {
    %c0_i32 = arith.constant 0 : i32
    %c0_i32_0 = arith.constant 0 : i32
    return %c0_i32 : i32
  }
  func.func @transform_1(%arg0: i32) -> (i32, i32, i32) {
    %c0_i32 = arith.constant 0 : i32
    %c0_i32_0 = arith.constant 0 : i32
    %c0_i32_1 = arith.constant 0 : i32
    return %arg0, %c0_i32, %c0_i32_0 : i32, i32, i32
  }
  func.func @transform_2(%arg0: i32) -> (i32, i32, i32) {
    %c0_i32 = arith.constant 0 : i32
    %c0_i32_0 = arith.constant 0 : i32
    %c0_i32_1 = arith.constant 0 : i32
    %c0_i32_2 = arith.constant 0 : i32
    return %c0_i32, %c0_i32_0, %c0_i32_1 : i32, i32, i32
  }
  func.func @transform_3(%arg0: i32) -> (i32, i32, i32) {
    %c0_i32 = arith.constant 0 : i32
    %c0_i32_0 = arith.constant 0 : i32
    %c0_i32_1 = arith.constant 0 : i32
    %c0_i32_2 = arith.constant 0 : i32
    return %c0_i32, %c0_i32_0, %c0_i32_1 : i32, i32, i32
  }
  func.func @transform_4(%arg0: i32) -> (i32, i32, i32) {
    %c0_i32 = arith.constant 0 : i32
    %c0_i32_0 = arith.constant 0 : i32
    %c0_i32_1 = arith.constant 0 : i32
    %c0_i32_2 = arith.constant 0 : i32
    return %c0_i32, %c0_i32_0, %c0_i32_1 : i32, i32, i32
  }
  func.func @transform_5(%arg0: i32) -> (i32, i32) {
    %c0_i32 = arith.constant 0 : i32
    %c0_i32_0 = arith.constant 0 : i32
    %c0_i32_1 = arith.constant 0 : i32
    return %c0_i32, %c0_i32_0 : i32, i32
  }
  func.func @transform_6(%arg0: i32) -> (i32, i32) {
    %c0_i32 = arith.constant 0 : i32
    %c0_i32_0 = arith.constant 0 : i32
    %c0_i32_1 = arith.constant 0 : i32
    return %c0_i32, %c0_i32_0 : i32, i32
  }
  func.func @transform_7(%arg0: i32) -> (i32, i32) {
    %c0_i32 = arith.constant 0 : i32
    %c0_i32_0 = arith.constant 0 : i32
    %c0_i32_1 = arith.constant 0 : i32
    return %c0_i32, %c0_i32_0 : i32, i32
  }
  func.func @transform_8(%arg0: i32) -> (i32, i32) {
    %c0_i32 = arith.constant 0 : i32
    %c0_i32_0 = arith.constant 0 : i32
    %c0_i32_1 = arith.constant 0 : i32
    return %c0_i32, %c0_i32_0 : i32, i32
  }
  func.func @transform_9(%arg0: i32) -> (i32, i32, i32) {
    %c0_i32 = arith.constant 0 : i32
    %c0_i32_0 = arith.constant 0 : i32
    %c0_i32_1 = arith.constant 0 : i32
    return %arg0, %c0_i32, %c0_i32_0 : i32, i32, i32
  }
  func.func @transform_10(%arg0: i32) -> (i32, i32, i32) {
    %c0_i32 = arith.constant 0 : i32
    %c0_i32_0 = arith.constant 0 : i32
    %c0_i32_1 = arith.constant 0 : i32
    return %arg0, %c0_i32, %c0_i32_0 : i32, i32, i32
  }
  func.func @transform_11(%arg0: i32) -> (i32, i32, i32) {
    %c0_i32 = arith.constant 0 : i32
    %c0_i32_0 = arith.constant 0 : i32
    %c0_i32_1 = arith.constant 0 : i32
    return %arg0, %c0_i32, %c0_i32_0 : i32, i32, i32
  }
}

</mosaic_0001>

<bundles_post_ra>
// kernel: encoder_forward.1
= control target key start
LH: loop header
LB: loop body
LE: loop exit
PB: predicated region body
PF: predicated region fallthrough
CT: control target
= control target key end

     0   :  { %s7687_s0 = inlined_call_operand.<no memory space> [shape: f32[1], index: 0, kind: input, shape index: {}]   ;;  %s7688_s1 = inlined_call_operand.vmem [shape: f32[2,32,128], index: 1, kind: input, shape index: {}]   ;;  %s7689_s2 = inlined_call_operand.vmem [shape: bf16[4,384,128], index: 2, kind: input, shape index: {}]   ;;  %s7690_s3 = inlined_call_operand.vmem [shape: bf16[4,384,128], index: 3, kind: input, shape index: {}]   ;;  %s7691_s4 = inlined_call_operand.hbm [shape: bf16[4,384,128], index: 4, kind: input, shape index: {}]   ;;  %s7692_s5 = inlined_call_operand.vmem [shape: bf16[128,128], index: 5, kind: input, shape index: {}]   ;;  %s7693_s6 = inlined_call_operand.vmem [shape: bf16[128,128], index: 6, kind: input, shape index: {}]   ;;  %s7694_s7 = inlined_call_operand.vmem [shape: bf16[16,32], index: 7, kind: input, shape index: {}]   ;;  %s7695_s8 = inlined_call_operand.vmem [shape: bf16[8,16], index: 8, kind: input, shape index: {}]   ;;  %s7696_s9 = inlined_call_operand.vmem [shape: f32[2,32,128], index: 9, kind: output, shape index: {0}]   ;;  %s7697_s10 = inlined_call_operand.vmem [shape: f32[2,16,128], index: 10, kind: output, shape index: {1}]   ;;  %s7698_s11 = inlined_call_operand.vmem [shape: f32[2,8,128], index: 11, kind: output, shape index: {2}]  }
   0x1   :  { %17 = sst [smem:[#allocation2]] %s7687_s0 }
   0x2   :  { %18 = vsyncpa [#allocation4], 0  ;;  %s6559_s19 = smov 0  }
   0x3 LB: > { %s6565_s20 = sadd.s32 4294967295, %s6488_s19   ;;  %p4634_p0 = scmp.ge.s32.totalorder %s6488_s19, 1  ;;  %s6488_s19 = sphi %s6559_s19, %s24_s19  }
   0x4   : > { %p301_p1 = scmp.lt.s32.totalorder %s6488_s19, 3  ;;  %s6490_s21 = smov [#allocation3]  }
   0x5   : > { %s322_s22 = sshll.u32 %s6490_s21, 4  ;;  %p7699_p3 = scmp.eq.s32.totalorder %s6565_s20, 0  ;;  %s323_s22 = int_to_ptr.vmem [resolvable:$true] %s322_s22 }
   0x6   : > { %p6569_p2 = pnand %p4634_p0, %p301_p1  ;;  %s6450_s26 = scalar_lea.hbm %s7691_s4, 12288 }
   0x7   : > { %p6451_p6 = scmp.ne.s32.totalorder %s7691_s4, %s6450_s26  ;;  %p6457_p10 = scmp.lt.u32.totalorder %s6450_s26, %s7691_s4 }
   0x8   : > { %s7701_s0 = scalar_select %p6569_p2, 1, 0 }
   0x9   : > { %p6121_p4 = pneg %p6569_p2 }
   0xb   : > { %p6578_p5 = pnand %p7699_p3, %p6121_p4 }
   0xd   : > { %p6452_p7 = pneg %p6578_p5 }
   0xf   : > { %p6453_p8 = pnand %p6452_p7, %p6451_p6 }
  0x11   : > { %p6454_p9 = pneg %p6453_p8 }
  0x13   : > { %p6459_p11 = pnand %p6457_p10, %p6454_p9 }
  0x15   : > { %6462 = shalt.err (!%p6459_p11)
}
  0x16   : > { %s6463_s12 = scalar_lea.vmem %s323_s22, 12288  ;;  %p6471_p1 = scmp.lt.s32.totalorder %s323_s22, %s323_s22 }
  0x17   : > { %p6464_p12 = scmp.ne.s32.totalorder %s323_s22, %s6463_s12  ;;  %p6472_p4 = scmp.lt.s32.totalorder %s6463_s12, %s6463_s12 }
  0x19   : > { %p6466_p13 = pnand %p6464_p12, %p6452_p7  ;;  %p6473_p3 = por %p6472_p4, %p6471_p1 }
  0x1b   : > { %p6467_p0 = pneg %p6466_p13 }
  0x1d   : > { %p6474_p2 = pnand %p6473_p3, %p6467_p0 }
  0x1f   : > { %6477 = shalt.err (!%p6474_p2)
}
  0x20   : > { %s6491_s13 = smov 64   ;;  %s6492_s14 = smov 4  }
  0x21   : > { %6124 = dma.hbm_to_vmem [thread:$0]  (!%p6578_p5), %s7691_s4, 12288, %s323_s22, [#allocation4], %s6491_s13, %s6491_s13, %s6492_s14  }
  0x22   : > { %p7703_p6 = scmp.ne.s32.totalorder %s7701_s0, 0 }
  0x23   : > { %p7704_p8 = scmp.eq.s32.totalorder (!%p7703_p6), %s6565_s20, 0 }
  0x24   : > { %358 = sbr.rel (%p7703_p6) target bundleno = 3677 (0xe5d), region = 56 }
  0x2b   : > { %6483 = dma.done.wait (%p7704_p8), [#allocation4], 12288   ;;  %p7705_p7 = pmov %p7704_p8 }
  0x2c   : > { %v6141_v0 = vld [vmem:[%s7689_s2 + $0x40] sm:$0xff]   ;;  %v6144_v3 = vld [vmem:[%s7689_s2 + $0x48] sm:$0xff]   ;;  %v6147_v6 = vld [vmem:[%s7689_s2 + $0x50] sm:$0xff]   ;;  %v432_v8 = vlaneseq  ;;  %p407_p2 = scmp.lt.s32.totalorder %s6565_s20, 1  ;;  %vm6493_vm5 = vmmov 1   ;;  %s427_s24 = sld [smem:[#allocation2]] }
  0x2d   : > { %6485 = vsyncadd (%p7705_p7), [#allocation4], 4294955008  ;;  %v6142_v1 = vld [vmem:[%s7689_s2] sm:$0xff]   ;;  %5400 = vmatprep.subr.bf16.mxu0 %v6141_v0  ;;  %v6145_v4 = vld [vmem:[%s7689_s2 + $0x8] sm:$0xff]  }
  0x2e   : > { %v6143_v2 = vld [vmem:[%s7689_s2 + $0x80] sm:$0xff]   ;;  %5401 = vmatpush3.bf16.msra.mxu0 %v6142_v1  ;;  %v6146_v5 = vld [vmem:[%s7689_s2 + $0x88] sm:$0xff]   ;;  %v6148_v7 = vld [vmem:[%s7689_s2 + $0x10] sm:$0xff]   ;;  %v6641_v13 = vshrl.u32 %v432_v8, 7  ;;  %s7729_s20 = smov (!%p407_p2, %s6565_s20), 1 }
  0x2f   : > { %5823 = vmatprep.subr.bf16.mxu1 %v6143_v2  ;;  %5402 = vmatprep.subr.bf16.mxu0 %v6144_v3  ;;  %v6149_v9 = vld [vmem:[%s7689_s2 + $0x90] sm:$0xff]   ;;  %v6150_v10 = vld [vmem:[%s7689_s2 + $0x58] sm:$0xff]   ;;  %v6153_v14 = vld [vmem:[%s7689_s2 + $0x60] sm:$0xff]   ;;  %s5387_s13 = sshll.u32 %s7729_s20, 5  ;;  %s5389_s26 = sshll.u32 %s7729_s20, 4 }
  0x30   : > { %5824 = vmatpush3.bf16.msra.mxu1 %v6143_v2  ;;  %v6151_v11 = vld [vmem:[%s7689_s2 + $0x18] sm:$0xff]   ;;  %v6155_v15 = vld [vmem:[%s7689_s2 + $0xa0] sm:$0xff]   ;;  %v6656_v17 = vadd.s32 8, %v6641_v13  ;;  %v6156_v18 = vld [vmem:[%s7689_s2 + $0x68] sm:$0xff]   ;;  %v436_v19 = vadd.s32 24, %v6641_v13  ;;  %v441_v20 = vand.u32 15, %v6641_v13  ;;  %s6683_s25 = scalar_lea.vmem %s7688_s1, %s5387_s13  ;;  %s416_s12 = scalar_lea.vmem %s7696_s9, %s5387_s13 }
  0x31   : > { %5825 = vmatprep.subr.bf16.mxu1 %v6146_v5  ;;  %v6152_v12 = vld [vmem:[%s7689_s2 + $0x98] sm:$0xff]   ;;  %v6154_v16 = vld [vmem:[%s7689_s2 + $0x20] sm:$0xff]   ;;  %v6158_v21 = vld [vmem:[%s7689_s2 + $0xa8] sm:$0xff]   ;;  %v435_v22 = vadd.s32 16, %v6641_v13  ;;  %vm497_vm0 = vcmp.lt.s32.totalorder %v6641_v13, 1  ;;  %vm518_vm1 = vcmp.lt.s32.totalorder %v6641_v13, 7  ;;  %s421_s29 = scalar_lea.vmem %s7697_s10, %s5389_s26 }
  0x32   : > { %5403 = vmatpush3.bf16.msra.mxu0 %v6145_v4  ;;  %v6157_v23 = vld [vmem:[%s7689_s2 + $0x28] sm:$0xff]   ;;  %v448_v24 = vand.u32 15, %v6656_v17  ;;  %v6159_v25 = vld [vmem:[%s7689_s2 + $0x70] sm:$0xff]   ;;  %v462_v26 = vand.u32 15, %v436_v19  ;;  %v6162_v29 = vld [vmem:[%s7689_s2 + $0x78] sm:$0xff]   ;;  %vm6693_vm2 = vcmp.ne.s32.totalorder %v441_v20, 0 }
  0x33   : > { %5404 = vmatprep.subr.bf16.mxu0 %v6147_v6  ;;  %v6160_v27 = vld [vmem:[%s7689_s2 + $0x30] sm:$0xff]   ;;  %v6164_v31 = vld [vmem:[%s7689_s2 + $0xb8] sm:$0xff]   ;;  %v428_v32 = vld [vmem:[%s6683_s25] sm:$0xff]  ;;  %v455_v37 = vand.u32 15, %v435_v22  ;;  %s4645_s15 = sshll.u32 %s7729_s20, 3 }
  0x34   : > { %5826 = vmatpush3.bf16.msra.mxu1 %v6146_v5  ;;  %v6161_v28 = vld [vmem:[%s7689_s2 + $0xb0] sm:$0xff]   ;;  %v429_v33 = vld [vmem:[%s6683_s25 + $0x8] sm:$0xff]  ;;  %v431_v34 = vld [vmem:[%s6683_s25 + $0x18] sm:$0xff]  ;;  %vm6703_vm3 = vcmp.ne.s32.totalorder %v448_v24, 15  ;;  %vm6707_vm4 = vcmp.ne.s32.totalorder %v462_v26, 15  ;;  %v493_v38 = vrot.slane %v428_v32, 7  ;;  %s425_s18 = scalar_lea.vmem %s7698_s11, %s4645_s15 }
  0x35   : > { %5827 = vmatprep.subr.bf16.mxu1 %v6149_v9  ;;  %v494_v39 = vrot.slane %v429_v33, 7  ;;  %v537_v40 = vpack.c.bf16 %v429_v33, %v428_v32  ;;  %v496_v41 = vrot.slane %v431_v34, 7  ;;  %v430_v42 = vld [vmem:[%s6683_s25 + $0x10] sm:$0xff]  ;;  %vm6715_vm6 = vmpackc.low %vm6493_vm5, %vm6693_vm2  ;;  %v514_v44 = vrot.slane %v428_v32, 1  ;;  %v6163_v48 = vld [vmem:[%s7689_s2 + $0x38] sm:$0xff]  }
  0x36   : > { %5405 = vmatpush3.bf16.msra.mxu0 %v6148_v7  ;;  %v515_v45 = vrot.slane %v429_v33, 1  ;;  %v516_v46 = vrot.slane %v430_v42, 1  ;;  %v517_v47 = vrot.slane %v431_v34, 1  ;;  %vm6729_vm7 = vmpackc.low %vm6703_vm3, %vm6493_vm5  ;;  %vm5391_vm9 = vcmp.ne.s32.totalorder %v455_v37, 0  ;;  %v6165_v55 = vld [vmem:[%s7689_s2 + $0x100] sm:$0xff]   ;;  %v6168_v1 = vld [vmem:[%s7689_s2 + $0x108] sm:$0xff]  }
  0x37   : > { %5406 = vmatprep.subr.bf16.mxu0 %v6150_v10  ;;  %765 = vmatprep.mubr.bf16.mxu0 %v537_v40  ;;  %v500_v49 = vsel %vm497_vm0, %v493_v38, %v494_v39  ;;  %v501_v50 = vsel %vm497_vm0, %v496_v41, %v493_v38  ;;  %vm6740_vm8 = vmpackc.low %vm6707_vm4, %vm6493_vm5  ;;  %v6166_v59 = vld [vmem:[%s7689_s2 + $0x140] sm:$0xff]   ;;  %v538_v62 = vpack.c.bf16 %v431_v34, %v430_v42  ;;  %v495_v63 = vrot.slane %v430_v42, 7  ;;  %v6169_v3 = vld [vmem:[%s7689_s2 + $0x148] sm:$0xff]  }
  0x38   : > { %5828 = vmatpush3.bf16.msra.mxu1 %v6149_v9  ;;  %v520_v52 = vsel %vm518_vm1, %v515_v45, %v516_v46  ;;  %v521_v53 = vsel %vm518_vm1, %v514_v44, %v515_v45  ;;  %v519_v57 = vsel %vm518_vm1, %v516_v46, %v517_v47  ;;  %v522_v58 = vsel %vm518_vm1, %v517_v47, %v514_v44  ;;  %v6167_v61 = vld [vmem:[%s7689_s2 + $0xc0] sm:$0xff]   ;;  %vm6760_vm10 = vmpackc.low %vm6493_vm5, %vm5391_vm9  ;;  %v6170_v4 = vld [vmem:[%s7689_s2 + $0xc8] sm:$0xff]  }
  0x39   : > { %5829 = vmatprep.subr.bf16.mxu1 %v6152_v12  ;;  %v4680_v56 = vpack.c.bf16 %v520_v52, %v521_v53  ;;  %v4672_v60 = vpack.c.bf16 %v500_v49, %v501_v50  ;;  %v4684_v2 = vpack.c.bf16 %v522_v58, %v519_v57  ;;  %v498_v5 = vsel %vm497_vm0, %v495_v63, %v496_v41  ;;  %v6171_v8 = vld [vmem:[%s7689_s2 + $0x110] sm:$0xff]   ;;  %v6180_v19 = vld [vmem:[%s7689_s2 + $0x128] sm:$0xff]   ;;  %v6187_v26 = vld [vmem:[%s7689_s2 + $0x178] sm:$0xff]  }
  0x3a   : > { %5407 = vmatpush3.bf16.msra.mxu0 %v6151_v11  ;;  %v499_v6 = vsel %vm497_vm0, %v494_v39, %v495_v63  ;;  %v6172_v9 = vld [vmem:[%s7689_s2 + $0x150] sm:$0xff]   ;;  %v6174_v11 = vld [vmem:[%s7689_s2 + $0x118] sm:$0xff]   ;;  %v6181_v20 = vld [vmem:[%s7689_s2 + $0x168] sm:$0xff]   ;;  %v6846_v37 = vstv %s427_s24  ;;  %vm6495_vm5 = vmmov 0  }
  0x3b   : > { %5408 = vmatprep.subr.bf16.mxu0 %v6153_v14  ;;  %5839 = vmatprep.mubr.msk.bf16.mxu1 %vm6729_vm7, %v4680_v56  ;;  %v4676_v7 = vpack.c.bf16 %v498_v5, %v499_v6  ;;  %v6173_v10 = vld [vmem:[%s7689_s2 + $0xd0] sm:$0xff]   ;;  %v6176_v14 = vld [vmem:[%s7689_s2 + $0xd8] sm:$0xff]   ;;  %v6238_v43 = vld [vmem:[%s7692_s5] sm:$0xff]  }
  0x3c   : > { %5830 = vmatpush3.bf16.msra.mxu1 %v6152_v12  ;;  %v6175_v12 = vld [vmem:[%s7689_s2 + $0x158] sm:$0xff]   ;;  %v6183_v22 = vld [vmem:[%s7689_s2 + $0x130] sm:$0xff]   ;;  %v6239_v51 = vld [vmem:[%s7692_s5 + $0x8] sm:$0xff]  }
  0x3d   : > { %5831 = vmatprep.subr.bf16.mxu1 %v6155_v15  ;;  %v6185_v24 = vld [vmem:[%s7689_s2 + $0xf0] sm:$0xff]   ;;  %v6241_v0 = vld [vmem:[%s7692_s5 + $0x18] sm:$0xff]  }
  0x3e   : > { %5409 = vmatpush3.bf16.msra.mxu0 %v6154_v16  ;;  %v6178_v16 = vld [vmem:[%s7689_s2 + $0x160] sm:$0xff]   ;;  %v6240_v54 = vld [vmem:[%s7692_s5 + $0x10] sm:$0xff]  }
  0x3f   : > { %5410 = vmatprep.subr.bf16.mxu0 %v6156_v18  ;;  %v6179_v18 = vld [vmem:[%s7689_s2 + $0xe0] sm:$0xff]  }
  0x40   : > { %5832 = vmatpush3.bf16.msra.mxu1 %v6155_v15  ;;  %v6177_v15 = vld [vmem:[%s7689_s2 + $0x120] sm:$0xff]  }
  0x41   : > { %5833 = vmatprep.subr.bf16.mxu1 %v6158_v21 }
  0x42   : > { %5411 = vmatpush3.bf16.msra.mxu0 %v6157_v23  ;;  %v6184_v23 = vld [vmem:[%s7689_s2 + $0x170] sm:$0xff]  }
  0x43   : > { %5412 = vmatprep.subr.bf16.mxu0 %v6159_v25  ;;  %v6186_v25 = vld [vmem:[%s7689_s2 + $0x138] sm:$0xff]  }
  0x44   : > { %5834 = vmatpush3.bf16.msra.mxu1 %v6158_v21  ;;  %v6182_v21 = vld [vmem:[%s7689_s2 + $0xe8] sm:$0xff]  }
  0x45   : > { %5835 = vmatprep.subr.bf16.mxu1 %v6161_v28 }
  0x46   : > { %5413 = vmatpush3.bf16.msra.mxu0 %v6160_v27  ;;  %v6188_v27 = vld [vmem:[%s7689_s2 + $0xf8] sm:$0xff]  }
  0x47   : > { %5414 = vmatprep.subr.bf16.mxu0 %v6162_v29  ;;  %v6843_v29 = vld [vmem:[%s7689_s2 + $0x200] sm:$0xff]  }
  0x48   : > { %5836 = vmatpush3.bf16.msra.mxu1 %v6161_v28  ;;  %v6189_v28 = vld [vmem:[%s7689_s2 + $0x1c0] sm:$0xff]  }
  0x49   : > { %5837 = vmatprep.subr.bf16.mxu1 %v6164_v31 }
  0x4a   : > { %5415 = vmatpush3.bf16.msra.mxu0 %v6163_v48 }
  0x4b   : > { %5438 = vmatprep.subr.bf16.mxu0 %v6165_v55 }
  0x4c   : > { %5838 = vmatpush3.bf16.msra.mxu1 %v6164_v31 }
  0x4d   : > { %4673 = vmatmul.mubr.msk.bf16.vlgmr.msra.gmra.mrb[0].mxu0 %vm6715_vm6, %v4672_v60  ;;  %5843 = vmatprep.subr.bf16.mxu1 %v6166_v59 }
  0x4e   : > { %773 = vmatprep.mubr.bf16.mxu0 %v538_v62  ;;  %5439 = vmatpush3.bf16.msra.mxu0 %v6167_v61 }
  0x4f   : > { %5840 = vmatmul.mubr.msk.bf16.vlgmr.msra.gmra.mrb[0].mxu1 %vm6740_vm8, %v4684_v2  ;;  %5440 = vmatprep.subr.bf16.mxu0 %v6168_v1 }
  0x50   : > { %5844 = vmatpush3.bf16.msra.mxu1 %v6166_v59 }
  0x51   : > { %5845 = vmatprep.subr.bf16.mxu1 %v6169_v3 }
  0x52   : > { %5441 = vmatpush3.bf16.msra.mxu0 %v6170_v4 }
  0x53   : > { %5442 = vmatprep.subr.bf16.mxu0 %v6171_v8 }
  0x54   : > { %5846 = vmatpush3.bf16.msra.mxu1 %v6169_v3 }
  0x55   : > { %4677 = vmatmul.mubr.msk.bf16.gmra.mrb[4].mxu0 %vm6760_vm10, %v4676_v7  ;;  %5847 = vmatprep.subr.bf16.mxu1 %v6172_v9 }
  0x56   : > { %5443 = vmatpush3.bf16.msra.mxu0 %v6173_v10 }
  0x57   : > { %5444 = vmatprep.subr.bf16.mxu0 %v6174_v11 }
  0x58   : > { %5848 = vmatpush3.bf16.msra.mxu1 %v6172_v9 }
  0x59   : > { %5849 = vmatprep.subr.bf16.mxu1 %v6175_v12 }
  0x5a   : > { %5445 = vmatpush3.bf16.msra.mxu0 %v6176_v14 }
  0x5b   : > { %5446 = vmatprep.subr.bf16.mxu0 %v6177_v15 }
  0x5c   : > { %5850 = vmatpush3.bf16.msra.mxu1 %v6175_v12 }
  0x5d   : > { %5851 = vmatprep.subr.bf16.mxu1 %v6178_v16 }
  0x5e   : > { %5447 = vmatpush3.bf16.msra.mxu0 %v6179_v18 }
  0x5f   : > { %5448 = vmatprep.subr.bf16.mxu0 %v6180_v19 }
  0x60   : > { %5852 = vmatpush3.bf16.msra.mxu1 %v6178_v16 }
  0x61   : > { %5853 = vmatprep.subr.bf16.mxu1 %v6181_v20 }
  0x62   : > { %5449 = vmatpush3.bf16.msra.mxu0 %v6182_v21 }
  0x63   : > { %5450 = vmatprep.subr.bf16.mxu0 %v6183_v22 }
  0x64   : > { %5854 = vmatpush3.bf16.msra.mxu1 %v6181_v20  ;;  %v6191_v20 = vld [vmem:[%s7689_s2 + $0x180] sm:$0xff]  }
  0x65   : > { %5855 = vmatprep.subr.bf16.mxu1 %v6184_v23 }
  0x66   : > { %5451 = vmatpush3.bf16.msra.mxu0 %v6185_v24  ;;  %v6192_v24 = vld [vmem:[%s7689_s2 + $0x1c8] sm:$0xff]  }
  0x67   : > { %5452 = vmatprep.subr.bf16.mxu0 %v6186_v25  ;;  %v6193_v25 = vld [vmem:[%s7689_s2 + $0x208] sm:$0xff]  }
  0x68   : > { %5856 = vmatpush3.bf16.msra.mxu1 %v6184_v23 }
  0x69   : > { %5857 = vmatprep.subr.bf16.mxu1 %v6187_v26 }
  0x6a   : > { %5453 = vmatpush3.bf16.msra.mxu0 %v6188_v27  ;;  %v6195_v27 = vld [vmem:[%s7689_s2 + $0x1d0] sm:$0xff]  }
  0x6b   : > { %5476 = vmatprep.subr.bf16.mxu0 %v6189_v28  ;;  %v6196_v28 = vld [vmem:[%s7689_s2 + $0x210] sm:$0xff]  }
  0x6c   : > { %5858 = vmatpush3.bf16.msra.mxu1 %v6187_v26  ;;  %v6194_v26 = vld [vmem:[%s7689_s2 + $0x188] sm:$0xff]  }
  0x6d   : > { %5863 = vmatprep.subr.bf16.mxu1 %v6843_v29 }
 0x120   : > { %v5416_v30 = vpop.f32.mrb[0].mxu0 }
 0x121   : > { %v5417_v31 = vpop.f32.mrb[1].mxu0 }
 0x122   : > { %v5418_v32 = vadd.f32 %v5417_v31, %v5416_v30  ;;  %v5419_v33 = vpop.f32.mrb[2].mxu0  ;;  %v5841_v34 = vpop.f32.mrb[0].mxu1  ;;  %v6198_v30 = vld [vmem:[%s7689_s2 + $0x1d8] sm:$0xff]  }
 0x123   : > { %v5420_v35 = vpop.f32.mrb[3].mxu0  ;;  %v816_v36 = vpop.f32.mrb[1].mxu1  ;;  %v6199_v31 = vld [vmem:[%s7689_s2 + $0x218] sm:$0xff]  }
 0x124   : > { %v5421_v38 = vadd.f32 %v5420_v35, %v5419_v33  ;;  %v817_v39 = vadd.f32 %v5418_v32, %v816_v36  ;;  %v5842_v40 = vpop.f32.mrb[2].mxu1  ;;  %v6200_v32 = vld [vmem:[%s7689_s2 + $0x198] sm:$0xff]   ;;  %v6201_v33 = vld [vmem:[%s7689_s2 + $0x1e0] sm:$0xff]   ;;  %v6204_v36 = vld [vmem:[%s7689_s2 + $0x1e8] sm:$0xff]  }
 0x125   : > { %v819_v41 = vpop.f32.mrb[3].mxu1  ;;  %v6203_v35 = vld [vmem:[%s7689_s2 + $0x1a0] sm:$0xff]  }
 0x126   : > { %vm831_vm11 = vcmp.ge.f32.partialorder %v817_v39, 0.0  ;;  %v836_v42 = vmul.f32 %v6846_v37, %v817_v39  ;;  %v820_v44 = vadd.f32 %v5421_v38, %v819_v41  ;;  %v6205_v38 = vld [vmem:[%s7689_s2 + $0x228] sm:$0xff]   ;;  %v6208_v41 = vld [vmem:[%s7689_s2 + $0x230] sm:$0xff]  }
 0x128   : > { %v840_v45 = vsel %vm831_vm11, %v817_v39, %v836_v42  ;;  %vm832_vm12 = vcmp.ge.f32.partialorder %v820_v44, 0.0  ;;  %v837_v46 = vmul.f32 %v6846_v37, %v820_v44  ;;  %v5422_v47 = vpop.f32.mrb[4].mxu0  ;;  %v6206_v39 = vld [vmem:[%s7689_s2 + $0x1a8] sm:$0xff]   ;;  %v6209_v42 = vld [vmem:[%s7689_s2 + $0x1b0] sm:$0xff]  }
 0x129   : > { %v5423_v48 = vpop.f32.mrb[5].mxu0  ;;  %v844_v49 = vrot.slane %v840_v45, 7  ;;  %v856_v55 = vrot.slane %v840_v45, 1 }
 0x12a   : > { %v841_v50 = vsel %vm832_vm12, %v820_v44, %v837_v46  ;;  %v5424_v52 = vadd.f32 %v5423_v48, %v5422_v47  ;;  %v5425_v53 = vpop.f32.mrb[6].mxu0  ;;  %v6210_v44 = vld [vmem:[%s7689_s2 + $0x1f8] sm:$0xff]   ;;  %v6213_v47 = vld [vmem:[%s7689_s2 + $0x280] sm:$0xff]  }
 0x12b   : > { %v845_v56 = vrot.slane %v841_v50, 7  ;;  %v857_v57 = vrot.slane %v841_v50, 1  ;;  %v5426_v58 = vpop.f32.mrb[7].mxu0  ;;  %v870_v59 = vpack.c.bf16 %v841_v50, %v840_v45  ;;  %v6211_v45 = vld [vmem:[%s7689_s2 + $0x238] sm:$0xff]   ;;  %v6214_v48 = vld [vmem:[%s7689_s2 + $0x2c0] sm:$0xff]  }
 0x12c   : > { %v825_v60 = vadd.f32 %v5841_v34, %v5424_v52  ;;  %v5427_v61 = vadd.f32 %v5426_v58, %v5425_v53  ;;  %v6202_v34 = vld [vmem:[%s7689_s2 + $0x220] sm:$0xff]   ;;  %v6212_v46 = vld [vmem:[%s7689_s2 + $0x1b8] sm:$0xff]  }
 0x12d   : > { %v850_v62 = vsel %vm497_vm0, %v844_v49, %v845_v56  ;;  %1099 = vmatprep.mubr.bf16.mxu0 %v870_v59  ;;  %v862_v63 = vsel %vm518_vm1, %v856_v55, %v857_v57 }
 0x12e   : > { %vm833_vm13 = vcmp.ge.f32.partialorder %v825_v60, 0.0  ;;  %v838_v1 = vmul.f32 %v6846_v37, %v825_v60  ;;  %v828_v2 = vadd.f32 %v5842_v40, %v5427_v61  ;;  %v6207_v40 = vld [vmem:[%s7689_s2 + $0x1f0] sm:$0xff]  }
 0x130   : > { %v842_v3 = vsel %vm833_vm13, %v825_v60, %v838_v1  ;;  %vm834_vm14 = vcmp.ge.f32.partialorder %v828_v2, 0.0  ;;  %v839_v4 = vmul.f32 %v6846_v37, %v828_v2 }
 0x131   : > { %v846_v5 = vrot.slane %v842_v3, 7  ;;  %v858_v6 = vrot.slane %v842_v3, 1 }
 0x132   : > { %v843_v7 = vsel %vm834_vm14, %v828_v2, %v839_v4  ;;  %v6447_v2 = vld [vmem:[%s6683_s25 + $0x8] sm:$0xff] }
 0x133   : > { %v847_v8 = vrot.slane %v843_v7, 7  ;;  %v859_v9 = vrot.slane %v843_v7, 1  ;;  %v861_v10 = vsel %vm518_vm1, %v857_v57, %v858_v6  ;;  %v871_v11 = vpack.c.bf16 %v843_v7, %v842_v3 }
 0x134   : > { %v4768_v12 = vpack.c.bf16 %v861_v10, %v862_v63  ;;  %v849_v14 = vsel %vm497_vm0, %v845_v56, %v846_v5  ;;  %v6446_v63 = vld [vmem:[%s6683_s25] sm:$0xff] }
 0x135   : > { %v851_v15 = vsel %vm497_vm0, %v847_v8, %v844_v49  ;;  %v860_v16 = vsel %vm518_vm1, %v858_v6, %v859_v9  ;;  %v863_v18 = vsel %vm518_vm1, %v859_v9, %v856_v55  ;;  %v848_v19 = vsel %vm497_vm0, %v846_v5, %v847_v8 }
 0x136   : > { %v4760_v21 = vpack.c.bf16 %v850_v62, %v851_v15  ;;  %5859 = vmatprep.mubr.msk.bf16.mxu1 %vm6729_vm7, %v4768_v12  ;;  %v4772_v22 = vpack.c.bf16 %v863_v18, %v860_v16  ;;  %v4764_v23 = vpack.c.bf16 %v848_v19, %v849_v14  ;;  %v6448_v14 = vld [vmem:[%s6683_s25 + $0x10] sm:$0xff] }
 0x138   : > { %4761 = vmatmul.mubr.msk.bf16.vlgmr.msra.gmra.mrb[8].mxu0 %vm6715_vm6, %v4760_v21  ;;  %5860 = vmatmul.mubr.msk.bf16.vlgmr.msra.gmra.mrb[4].mxu1 %vm6740_vm8, %v4772_v22  ;;  %v6449_v21 = vld [vmem:[%s6683_s25 + $0x18] sm:$0xff] }
 0x139   : > { %1107 = vmatprep.mubr.bf16.mxu0 %v871_v11  ;;  %5477 = vmatpush3.bf16.msra.mxu0 %v6191_v20 }
 0x13a   : > { %5864 = vmatpush3.bf16.msra.mxu1 %v6843_v29  ;;  %5478 = vmatprep.subr.bf16.mxu0 %v6192_v24  ;;  %v6197_v29 = vld [vmem:[%s7689_s2 + $0x190] sm:$0xff]  }
 0x13b   : > { %5865 = vmatprep.subr.bf16.mxu1 %v6193_v25 }
 0x13d   : > { %5479 = vmatpush3.bf16.msra.mxu0 %v6194_v26 }
 0x13e   : > { %5866 = vmatpush3.bf16.msra.mxu1 %v6193_v25  ;;  %5480 = vmatprep.subr.bf16.mxu0 %v6195_v27 }
 0x13f   : > { %5867 = vmatprep.subr.bf16.mxu1 %v6196_v28 }
 0x140   : > { %4765 = vmatmul.mubr.msk.bf16.gmra.mrb[12].mxu0 %vm6760_vm10, %v4764_v23 }
 0x141   : > { %5481 = vmatpush3.bf16.msra.mxu0 %v6197_v29 }
 0x142   : > { %5868 = vmatpush3.bf16.msra.mxu1 %v6196_v28  ;;  %5482 = vmatprep.subr.bf16.mxu0 %v6198_v30 }
 0x143   : > { %5869 = vmatprep.subr.bf16.mxu1 %v6199_v31 }
 0x145   : > { %5483 = vmatpush3.bf16.msra.mxu0 %v6200_v32 }
 0x146   : > { %5870 = vmatpush3.bf16.msra.mxu1 %v6199_v31  ;;  %5484 = vmatprep.subr.bf16.mxu0 %v6201_v33  ;;  %v6215_v33 = vld [vmem:[%s7689_s2 + $0x240] sm:$0xff]  }
 0x147   : > { %5871 = vmatprep.subr.bf16.mxu1 %v6202_v34 }
 0x149   : > { %5485 = vmatpush3.bf16.msra.mxu0 %v6203_v35 }
 0x14a   : > { %5872 = vmatpush3.bf16.msra.mxu1 %v6202_v34  ;;  %5486 = vmatprep.subr.bf16.mxu0 %v6204_v36  ;;  %v6216_v36 = vld [vmem:[%s7689_s2 + $0x288] sm:$0xff]  }
 0x14b   : > { %5873 = vmatprep.subr.bf16.mxu1 %v6205_v38 }
 0x14d   : > { %5487 = vmatpush3.bf16.msra.mxu0 %v6206_v39  ;;  %v6217_v39 = vld [vmem:[%s7689_s2 + $0x2c8] sm:$0xff]  }
 0x14e   : > { %5874 = vmatpush3.bf16.msra.mxu1 %v6205_v38  ;;  %5488 = vmatprep.subr.bf16.mxu0 %v6207_v40 }
 0x14f   : > { %5875 = vmatprep.subr.bf16.mxu1 %v6208_v41 }
 0x151   : > { %5489 = vmatpush3.bf16.msra.mxu0 %v6209_v42 }
 0x152   : > { %5876 = vmatpush3.bf16.msra.mxu1 %v6208_v41  ;;  %5490 = vmatprep.subr.bf16.mxu0 %v6210_v44  ;;  %v6218_v41 = vld [vmem:[%s7689_s2 + $0x248] sm:$0xff]  }
 0x153   : > { %5877 = vmatprep.subr.bf16.mxu1 %v6211_v45 }
 0x155   : > { %5491 = vmatpush3.bf16.msra.mxu0 %v6212_v46  ;;  %v6219_v46 = vld [vmem:[%s7689_s2 + $0x290] sm:$0xff]  }
 0x156   : > { %5878 = vmatpush3.bf16.msra.mxu1 %v6211_v45  ;;  %5514 = vmatprep.subr.bf16.mxu0 %v6213_v47  ;;  %v6220_v47 = vld [vmem:[%s7689_s2 + $0x2d0] sm:$0xff]  }
 0x157   : > { %5883 = vmatprep.subr.bf16.mxu1 %v6214_v48 }
 0x20b   : > { %v5454_v49 = vpop.f32.mrb[8].mxu0  ;;  %v5861_v50 = vpop.f32.mrb[4].mxu1 }
 0x20c   : > { %v5455_v52 = vpop.f32.mrb[9].mxu0  ;;  %v1150_v53 = vpop.f32.mrb[5].mxu1 }
 0x20d   : > { %v5456_v55 = vadd.f32 %v5455_v52, %v5454_v49  ;;  %v5457_v56 = vpop.f32.mrb[10].mxu0  ;;  %v5862_v57 = vpop.f32.mrb[6].mxu1  ;;  %v6222_v49 = vld [vmem:[%s7689_s2 + $0x298] sm:$0xff]  }
 0x20e   : > { %v5458_v58 = vpop.f32.mrb[11].mxu0  ;;  %v1153_v59 = vpop.f32.mrb[7].mxu1  ;;  %v6224_v52 = vld [vmem:[%s7689_s2 + $0x258] sm:$0xff]  }
 0x20f   : > { %v1151_v60 = vadd.f32 %v5456_v55, %v1150_v53  ;;  %v5459_v61 = vadd.f32 %v5458_v58, %v5457_v56  ;;  %v6225_v53 = vld [vmem:[%s7689_s2 + $0x2a0] sm:$0xff]   ;;  %v6229_v58 = vld [vmem:[%s7689_s2 + $0x2e8] sm:$0xff]  }
 0x210   : > { %v6226_v55 = vld [vmem:[%s7689_s2 + $0x2e0] sm:$0xff]  }
 0x211   : > { %v1154_v62 = vadd.f32 %v5459_v61, %v1153_v59  ;;  %v6950_v1 = vadd.f32 %v6446_v63, %v1151_v60  ;;  %v6227_v56 = vld [vmem:[%s7689_s2 + $0x260] sm:$0xff]   ;;  %v6230_v59 = vld [vmem:[%s7689_s2 + $0x268] sm:$0xff]   ;;  %v6231_v60 = vld [vmem:[%s7689_s2 + $0x2b0] sm:$0xff]  }
 0x212   : > { %v6232_v61 = vld [vmem:[%s7689_s2 + $0x2f0] sm:$0xff]   ;;  %v6234_v63 = vld [vmem:[%s7689_s2 + $0x2b8] sm:$0xff]  }
 0x213   : > { %v6953_v3 = vadd.f32 %v6447_v2, %v1154_v62  ;;  %v5460_v4 = vpop.f32.mrb[12].mxu0  ;;  %v1181_v18 = vrot.slane %v6950_v1, 1  ;;  %v1169_v23 = vrot.slane %v6950_v1, 7  ;;  %v6233_v62 = vld [vmem:[%s7689_s2 + $0x270] sm:$0xff]   ;;  %v6235_v2 = vld [vmem:[%s7689_s2 + $0x2f8] sm:$0xff]  }
 0x214   : > { %v5461_v5 = vpop.f32.mrb[13].mxu0 }
 0x215   : > { %v5462_v6 = vadd.f32 %v5461_v5, %v5460_v4  ;;  %v5463_v7 = vpop.f32.mrb[14].mxu0  ;;  %v1195_v8 = vpack.c.bf16 %v6953_v3, %v6950_v1  ;;  %v1182_v12 = vrot.slane %v6953_v3, 1  ;;  %v1170_v19 = vrot.slane %v6953_v3, 7  ;;  %v6236_v4 = vld [vmem:[%s7689_s2 + $0x278] sm:$0xff]  }
 0x216   : > { %v5464_v9 = vpop.f32.mrb[15].mxu0 }
 0x217   : > { %v1159_v10 = vadd.f32 %v5861_v50, %v5462_v6  ;;  %v5465_v11 = vadd.f32 %v5464_v9, %v5463_v7  ;;  %1424 = vmatprep.mubr.bf16.mxu0 %v1195_v8  ;;  %v1187_v27 = vsel %vm518_vm1, %v1181_v18, %v1182_v12  ;;  %v1175_v29 = vsel %vm497_vm0, %v1169_v23, %v1170_v19  ;;  %v6223_v50 = vld [vmem:[%s7689_s2 + $0x2d8] sm:$0xff]  }
 0x219   : > { %v6959_v15 = vadd.f32 %v6448_v14, %v1159_v10  ;;  %v1162_v16 = vadd.f32 %v5862_v57, %v5465_v11  ;;  %v6228_v57 = vld [vmem:[%s7689_s2 + $0x2a8] sm:$0xff]  }
 0x21b   : > { %v1183_v20 = vrot.slane %v6959_v15, 1  ;;  %v6965_v22 = vadd.f32 %v6449_v21, %v1162_v16  ;;  %v1171_v40 = vrot.slane %v6959_v15, 7 }
 0x21d   : > { %v1172_v24 = vrot.slane %v6965_v22, 7  ;;  %v1184_v25 = vrot.slane %v6965_v22, 1  ;;  %v1186_v26 = vsel %vm518_vm1, %v1182_v12, %v1183_v20  ;;  %v1196_v38 = vpack.c.bf16 %v6965_v22, %v6959_v15 }
 0x21e   : > { %v4856_v28 = vpack.c.bf16 %v1186_v26, %v1187_v27  ;;  %v1174_v44 = vsel %vm497_vm0, %v1170_v19, %v1171_v40 }
 0x21f   : > { %v1176_v30 = vsel %vm497_vm0, %v1172_v24, %v1169_v23  ;;  %v1185_v31 = vsel %vm518_vm1, %v1183_v20, %v1184_v25  ;;  %v1188_v32 = vsel %vm518_vm1, %v1184_v25, %v1181_v18  ;;  %v1173_v42 = vsel %vm497_vm0, %v1171_v40, %v1172_v24 }
 0x220   : > { %5879 = vmatprep.mubr.msk.bf16.mxu1 %vm6729_vm7, %v4856_v28  ;;  %v4848_v34 = vpack.c.bf16 %v1175_v29, %v1176_v30  ;;  %v4860_v35 = vpack.c.bf16 %v1188_v32, %v1185_v31  ;;  %v4852_v45 = vpack.c.bf16 %v1173_v42, %v1174_v44 }
 0x222   : > { %4849 = vmatmul.mubr.msk.bf16.vlgmr.msra.gmra.mrb[16].mxu0 %vm6715_vm6, %v4848_v34  ;;  %5880 = vmatmul.mubr.msk.bf16.vlgmr.msra.gmra.mrb[8].mxu1 %vm6740_vm8, %v4860_v35 }
 0x223   : > { %1432 = vmatprep.mubr.bf16.mxu0 %v1196_v38  ;;  %5515 = vmatpush3.bf16.msra.mxu0 %v6215_v33 }
 0x224   : > { %5884 = vmatpush3.bf16.msra.mxu1 %v6214_v48  ;;  %5516 = vmatprep.subr.bf16.mxu0 %v6216_v36  ;;  %v6221_v48 = vld [vmem:[%s7689_s2 + $0x250] sm:$0xff]  }
 0x225   : > { %5885 = vmatprep.subr.bf16.mxu1 %v6217_v39 }
 0x227   : > { %5517 = vmatpush3.bf16.msra.mxu0 %v6218_v41 }
 0x228   : > { %5886 = vmatpush3.bf16.msra.mxu1 %v6217_v39  ;;  %5518 = vmatprep.subr.bf16.mxu0 %v6219_v46 }
 0x229   : > { %5887 = vmatprep.subr.bf16.mxu1 %v6220_v47 }
 0x22a   : > { %4853 = vmatmul.mubr.msk.bf16.gmra.mrb[20].mxu0 %vm6760_vm10, %v4852_v45 }
 0x22b   : > { %5519 = vmatpush3.bf16.msra.mxu0 %v6221_v48 }
 0x22c   : > { %5888 = vmatpush3.bf16.msra.mxu1 %v6220_v47  ;;  %5520 = vmatprep.subr.bf16.mxu0 %v6222_v49 }
 0x22d   : > { %5889 = vmatprep.subr.bf16.mxu1 %v6223_v50 }
 0x22f   : > { %5521 = vmatpush3.bf16.msra.mxu0 %v6224_v52 }
 0x230   : > { %5890 = vmatpush3.bf16.msra.mxu1 %v6223_v50  ;;  %5522 = vmatprep.subr.bf16.mxu0 %v6225_v53 }
 0x231   : > { %5891 = vmatprep.subr.bf16.mxu1 %v6226_v55 }
 0x233   : > { %5523 = vmatpush3.bf16.msra.mxu0 %v6227_v56 }
 0x234   : > { %5892 = vmatpush3.bf16.msra.mxu1 %v6226_v55  ;;  %5524 = vmatprep.subr.bf16.mxu0 %v6228_v57 }
 0x235   : > { %5893 = vmatprep.subr.bf16.mxu1 %v6229_v58 }
 0x237   : > { %5525 = vmatpush3.bf16.msra.mxu0 %v6230_v59 }
 0x238   : > { %5894 = vmatpush3.bf16.msra.mxu1 %v6229_v58  ;;  %5526 = vmatprep.subr.bf16.mxu0 %v6231_v60 }
 0x239   : > { %5895 = vmatprep.subr.bf16.mxu1 %v6232_v61 }
 0x23b   : > { %5527 = vmatpush3.bf16.msra.mxu0 %v6233_v62 }
 0x23c   : > { %5896 = vmatpush3.bf16.msra.mxu1 %v6232_v61  ;;  %5528 = vmatprep.subr.bf16.mxu0 %v6234_v63  ;;  %v6494_v63 = vmov 0.0  }
 0x23d   : > { %5897 = vmatprep.subr.bf16.mxu1 %v6235_v2 }
 0x23f   : > { %5529 = vmatpush3.bf16.msra.mxu0 %v6236_v4  ;;  %v6243_v4 = vld [vmem:[%s7692_s5 + $0x28] sm:$0xff]  }
 0x240   : > { %5898 = vmatpush3.bf16.msra.mxu1 %v6235_v2  ;;  %5911 = vmatprep.subr.bf16.mxu0 %v6494_v63  ;;  %v6242_v2 = vld [vmem:[%s7692_s5 + $0x20] sm:$0xff]  }
 0x241   : > { %5903 = vmatprep.subr.bf16.mxu1 %v6494_v63 }
 0x2f5   : > { %v5492_v5 = vpop.f32.mrb[16].mxu0  ;;  %v5881_v6 = vpop.f32.mrb[8].mxu1 }
 0x2f6   : > { %v5493_v7 = vpop.f32.mrb[17].mxu0  ;;  %v1475_v8 = vpop.f32.mrb[9].mxu1 }
 0x2f7   : > { %v5494_v9 = vadd.f32 %v5493_v7, %v5492_v5  ;;  %v5495_v10 = vpop.f32.mrb[18].mxu0  ;;  %v5882_v11 = vpop.f32.mrb[10].mxu1  ;;  %v6244_v5 = vld [vmem:[%s7692_s5 + $0x30] sm:$0xff]  }
 0x2f8   : > { %v5496_v12 = vpop.f32.mrb[19].mxu0  ;;  %v1478_v14 = vpop.f32.mrb[11].mxu1 }
 0x2f9   : > { %v1476_v16 = vadd.f32 %v5494_v9, %v1475_v8  ;;  %v5497_v18 = vadd.f32 %v5496_v12, %v5495_v10 }
 0x2fb   : > { %vm1490_vm15 = vcmp.ge.f32.partialorder %v1476_v16, 0.0  ;;  %v1494_v19 = vmul.f32 %v1476_v16, %v6846_v37  ;;  %v1479_v20 = vadd.f32 %v5497_v18, %v1478_v14 }
 0x2fd   : > { %v1498_v21 = vsel %vm1490_vm15, %v1476_v16, %v1494_v19  ;;  %vm1491_vm2 = vcmp.ge.f32.partialorder %v1479_v20, 0.0  ;;  %v1495_v23 = vmul.f32 %v1479_v20, %v6846_v37  ;;  %v5498_v24 = vpop.f32.mrb[20].mxu0 }
 0x2fe   : > { %v5499_v25 = vpop.f32.mrb[21].mxu0  ;;  %v1502_v26 = vrot.slane %v1498_v21, 7  ;;  %v1514_v30 = vrot.slane %v1498_v21, 1 }
 0x2ff   : > { %v1499_v27 = vsel %vm1491_vm2, %v1479_v20, %v1495_v23  ;;  %v5500_v28 = vadd.f32 %v5499_v25, %v5498_v24  ;;  %v5501_v29 = vpop.f32.mrb[22].mxu0 }
 0x300   : > { %v1503_v31 = vrot.slane %v1499_v27, 7  ;;  %v1515_v32 = vrot.slane %v1499_v27, 1  ;;  %v5502_v33 = vpop.f32.mrb[23].mxu0  ;;  %v1528_v34 = vpack.c.bf16 %v1499_v27, %v1498_v21 }
 0x301   : > { %v1484_v35 = vadd.f32 %v5881_v6, %v5500_v28  ;;  %v5503_v36 = vadd.f32 %v5502_v33, %v5501_v29 }
 0x302   : > { %v1508_v38 = vsel %vm497_vm0, %v1502_v26, %v1503_v31  ;;  %1757 = vmatprep.mubr.bf16.mxu0 %v1528_v34  ;;  %v1520_v39 = vsel %vm518_vm1, %v1514_v30, %v1515_v32  ;;  %v6237_v34 = vld [vmem:[%s7694_s7] sm:$0xff]  }
 0x303   : > { %vm1492_vm3 = vcmp.ge.f32.partialorder %v1484_v35, 0.0  ;;  %v1496_v40 = vmul.f32 %v1484_v35, %v6846_v37  ;;  %v1487_v41 = vadd.f32 %v5882_v11, %v5503_v36  ;;  %v6249_v36 = vld [vmem:[%s7690_s3 + $0x48] sm:$0xff]  }
 0x305   : > { %v1500_v42 = vsel %vm1492_vm3, %v1484_v35, %v1496_v40  ;;  %vm1493_vm4 = vcmp.ge.f32.partialorder %v1487_v41, 0.0  ;;  %v1497_v44 = vmul.f32 %v1487_v41, %v6846_v37  ;;  %v6245_v35 = vld [vmem:[%s7692_s5 + $0x38] sm:$0xff]   ;;  %v6253_v40 = vld [vmem:[%s7690_s3 + $0x10] sm:$0xff]  }
 0x306   : > { %v1504_v45 = vrot.slane %v1500_v42, 7  ;;  %v1516_v46 = vrot.slane %v1500_v42, 1 }
 0x307   : > { %v1501_v47 = vsel %vm1493_vm4, %v1487_v41, %v1497_v44  ;;  %v6255_v41 = vld [vmem:[%s7690_s3 + $0x58] sm:$0xff]   ;;  %v6258_v44 = vld [vmem:[%s7690_s3 + $0x60] sm:$0xff]  }
 0x308   : > { %v1505_v48 = vrot.slane %v1501_v47, 7  ;;  %v1517_v49 = vrot.slane %v1501_v47, 1  ;;  %v1519_v50 = vsel %vm518_vm1, %v1515_v32, %v1516_v46  ;;  %v1529_v52 = vpack.c.bf16 %v1501_v47, %v1500_v42  ;;  %v6256_v42 = vld [vmem:[%s7690_s3 + $0x18] sm:$0xff]   ;;  %v6262_v47 = vld [vmem:[%s7690_s3 + $0x28] sm:$0xff]  }
 0x309   : > { %v4944_v53 = vpack.c.bf16 %v1519_v50, %v1520_v39  ;;  %v1507_v55 = vsel %vm497_vm0, %v1503_v31, %v1504_v45  ;;  %v6252_v39 = vld [vmem:[%s7690_s3 + $0x50] sm:$0xff]  }
 0x30a   : > { %v1509_v56 = vsel %vm497_vm0, %v1505_v48, %v1502_v26  ;;  %v1518_v57 = vsel %vm518_vm1, %v1516_v46, %v1517_v49  ;;  %v1521_v58 = vsel %vm518_vm1, %v1517_v49, %v1514_v30  ;;  %v1506_v59 = vsel %vm497_vm0, %v1504_v45, %v1505_v48  ;;  %v6259_v45 = vld [vmem:[%s7690_s3 + $0x20] sm:$0xff]   ;;  %v6261_v46 = vld [vmem:[%s7690_s3 + $0x68] sm:$0xff]  }
 0x30b   : > { %v4936_v60 = vpack.c.bf16 %v1508_v38, %v1509_v56  ;;  %5899 = vmatprep.mubr.msk.bf16.mxu1 %vm6729_vm7, %v4944_v53  ;;  %v4948_v61 = vpack.c.bf16 %v1521_v58, %v1518_v57  ;;  %v4940_v62 = vpack.c.bf16 %v1506_v59, %v1507_v55  ;;  %v6250_v38 = vld [vmem:[%s7690_s3 + $0x8] sm:$0xff]   ;;  %v6254_v57 = vld [vmem:[%s7690_s3 + $0x90] sm:$0xff]   ;;  %v6257_v58 = vld [vmem:[%s7690_s3 + $0x98] sm:$0xff]  }
 0x30c   : > { %v6251_v56 = vld [vmem:[%s7690_s3 + $0x88] sm:$0xff]   ;;  %v6260_v59 = vld [vmem:[%s7690_s3 + $0xa0] sm:$0xff]  }
 0x30d   : > { %4937 = vmatmul.mubr.msk.bf16.vlgmr.msra.gmra.mrb[24].mxu0 %vm6715_vm6, %v4936_v60  ;;  %5900 = vmatmul.mubr.msk.bf16.vlgmr.msra.gmra.mrb[12].mxu1 %vm6740_vm8, %v4948_v61  ;;  %vm1840_vm6 = vcmask 261120   ;;  %v6263_v60 = vld [vmem:[%s7690_s3 + $0xa8] sm:$0xff]   ;;  %v6264_v61 = vld [vmem:[%s7690_s3 + $0x70] sm:$0xff]  }
 0x30e   : > { %1765 = vmatprep.mubr.bf16.mxu0 %v1529_v52  ;;  %5907 = vmatprep.mubr.msk.bf16.mxu1 %vm6495_vm5, %v6494_v63  ;;  %v6248_v52 = vld [vmem:[%s7690_s3 + $0x80] sm:$0xff]  }
 0x30f   : > { %5912 = vmatpush3.bf16.msra.mxu0 %v6238_v43  ;;  %v6266_v43 = vld [vmem:[%s7690_s3 + $0xb0] sm:$0xff]  }
 0x310   : > { %5913 = vmatprep.subr.bf16.mxu0 %v6494_v63 }
 0x313   : > { %5914 = vmatpush3.bf16.msra.mxu0 %v6239_v51  ;;  %v6267_v51 = vld [vmem:[%s7690_s3 + $0x78] sm:$0xff]  }
 0x314   : > { %5915 = vmatprep.subr.bf16.mxu0 %v6494_v63 }
 0x315   : > { %4941 = vmatmul.mubr.msk.bf16.gmra.mrb[28].mxu0 %vm6760_vm10, %v4940_v62  ;;  %v6265_v62 = vld [vmem:[%s7690_s3 + $0x30] sm:$0xff]  }
 0x316   : > { %5927 = vmatprep.mubr.msk.bf16.mxu0 %vm6495_vm5, %v6494_v63 }
 0x317   : > { %5916 = vmatpush3.bf16.msra.mxu0 %v6240_v54  ;;  %v6268_v54 = vld [vmem:[%s7690_s3 + $0x38] sm:$0xff]  }
 0x318   : > { %5917 = vmatprep.subr.bf16.mxu0 %v6494_v63 }
 0x31b   : > { %5918 = vmatpush3.bf16.msra.mxu0 %v6241_v0  ;;  %v6269_v0 = vld [vmem:[%s7690_s3 + $0xb8] sm:$0xff]  }
 0x31c   : > { %5919 = vmatprep.subr.bf16.mxu0 %v6494_v63 }
 0x31f   : > { %5920 = vmatpush3.bf16.msra.mxu0 %v6242_v2  ;;  %v6270_v2 = vld [vmem:[%s7690_s3 + $0x100] sm:$0xff]  }
 0x320   : > { %5921 = vmatprep.subr.bf16.mxu0 %v6494_v63 }
 0x323   : > { %5922 = vmatpush3.bf16.msra.mxu0 %v6243_v4  ;;  %v1995_v4 = vand.u32 7, %v6641_v13 }
 0x324   : > { %5923 = vmatprep.subr.bf16.mxu0 %v6494_v63 }
 0x325   : > { %vm5395_vm8 = vcmp.ne.s32.totalorder %v1995_v4, 0  ;;  %vm5397_vm10 = vcmp.ne.s32.totalorder %v1995_v4, 7 }
 0x327   : > { %5924 = vmatpush3.bf16.msra.mxu0 %v6244_v5  ;;  %v2002_v5 = vand.u32 7, %v6656_v17 }
 0x328   : > { %5925 = vmatprep.subr.bf16.mxu0 %v6494_v63 }
 0x329   : > { %vm5394_vm7 = vcmp.ne.s32.totalorder %v2002_v5, 0  ;;  %vm5396_vm9 = vcmp.ne.s32.totalorder %v2002_v5, 7 }
 0x32a   : > { %vm7239_vm11 = vmpackc.low %vm5394_vm7, %vm5395_vm8 }
 0x32b   : > { %5926 = vmatpush3.bf16.msra.mxu0 %v6245_v35  ;;  %vm7251_vm12 = vmpackc.low %vm5396_vm9, %vm5397_vm10  ;;  %v6282_v35 = vld [vmem:[%s7690_s3 + $0x120] sm:$0xff]  }
 0x32c   : > { %5931 = vmatprep.subr.bf16.mxu0 %v6494_v63 }
 0x3e0   : > { %v5530_v6 = vpop.f32.mrb[24].mxu0  ;;  %v5901_v7 = vpop.f32.mrb[12].mxu1 }
 0x3e1   : > { %v5531_v8 = vpop.f32.mrb[25].mxu0  ;;  %v1808_v9 = vpop.f32.mrb[13].mxu1 }
 0x3e2   : > { %v5532_v10 = vadd.f32 %v5531_v8, %v5530_v6  ;;  %v5533_v11 = vpop.f32.mrb[26].mxu0  ;;  %v5902_v12 = vpop.f32.mrb[14].mxu1 }
 0x3e3   : > { %v5534_v14 = vpop.f32.mrb[27].mxu0  ;;  %v1811_v16 = vpop.f32.mrb[15].mxu1 }
 0x3e4   : > { %v1809_v18 = vadd.f32 %v5532_v10, %v1808_v9  ;;  %v5535_v19 = vadd.f32 %v5534_v14, %v5533_v11 }
 0x3e6   : > { %v1823_v20 = vadd.f32 %v1809_v18, %v6950_v1  ;;  %v1812_v21 = vadd.f32 %v5535_v19, %v1811_v16  ;;  %v6344_v16 = vld [vmem:[%s7693_s6 + $0x10] sm:$0xff]  }
 0x3e8   : > { %1827 = vst [vmem:[%s416_s12] sm:$0xff] %v1823_v20  ;;  %v1824_v23 = vadd.f32 %v1812_v21, %v6953_v3  ;;  %v5536_v24 = vpop.f32.mrb[28].mxu0 }
 0x3e9   : > { %v5537_v25 = vpop.f32.mrb[29].mxu0 }
 0x3ea   : > { %1828 = vst [vmem:[%s416_s12 + $0x8] sm:$0xff] %v1824_v23  ;;  %v1833_v26 = vpack.c.bf16 %v1824_v23, %v1823_v20  ;;  %v5538_v27 = vadd.f32 %v5537_v25, %v5536_v24  ;;  %v5539_v28 = vpop.f32.mrb[30].mxu0  ;;  %v6271_v24 = vld [vmem:[%s7690_s3 + $0xc0] sm:$0xff]   ;;  %v6345_v23 = vld [vmem:[%s7693_s6 + $0x18] sm:$0xff]  }
 0x3eb   : > { %v5540_v29 = vpop.f32.mrb[31].mxu0  ;;  %v6272_v25 = vld [vmem:[%s7690_s3 + $0x140] sm:$0xff]  }
 0x3ec   : > { %v1817_v30 = vadd.f32 %v5901_v7, %v5538_v27  ;;  %v5541_v31 = vadd.f32 %v5540_v29, %v5539_v28  ;;  %5904 = vmatpush3.bf16.msra.mxu1 %v1833_v26  ;;  %v6273_v28 = vld [vmem:[%s7690_s3 + $0x108] sm:$0xff]  }
 0x3ed   : > { %5905 = vmatprep.subr.bf16.mxu1 %v6494_v63  ;;  %v6274_v29 = vld [vmem:[%s7690_s3 + $0xc8] sm:$0xff]  }
 0x3ee   : > { %v1825_v32 = vadd.f32 %v1817_v30, %v6959_v15  ;;  %v1820_v33 = vadd.f32 %v5902_v12, %v5541_v31  ;;  %v6246_v15 = vld [vmem:[%s7690_s3 + $0x40] sm:$0xff]   ;;  %v6275_v30 = vld [vmem:[%s7690_s3 + $0x148] sm:$0xff]   ;;  %v6276_v31 = vld [vmem:[%s7690_s3 + $0x110] sm:$0xff]  }
 0x3f0   : > { %1829 = vst [vmem:[%s416_s12 + $0x10] sm:$0xff] %v1825_v32  ;;  %v1826_v1 = vadd.f32 %v1820_v33, %v6965_v22  ;;  %v6247_v22 = vld [vmem:[%s7690_s3] sm:$0xff]   ;;  %v6278_v33 = vld [vmem:[%s7690_s3 + $0x150] sm:$0xff]  }
 0x3f2   : > { %1830 = vst [vmem:[%s416_s12 + $0x18] sm:$0xff] %v1826_v1  ;;  %v1834_v3 = vpack.c.bf16 %v1826_v1, %v1825_v32  ;;  %v6277_v32 = vld [vmem:[%s7690_s3 + $0xd0] sm:$0xff]   ;;  %v6279_v1 = vld [vmem:[%s7690_s3 + $0x118] sm:$0xff]  }
 0x3f4   : > { %5906 = vmatpush3.bf16.msra.mxu1 %v1834_v3  ;;  %v6280_v3 = vld [vmem:[%s7690_s3 + $0xd8] sm:$0xff]  }
 0x3f5   : > { %5564 = vmatprep.subr.bf16.mxu1 %v6246_v15  ;;  %v6283_v15 = vld [vmem:[%s7690_s3 + $0xe0] sm:$0xff]  }
 0x3f7   : > { %5908 = vmatmul.mubr.msk.bf16.vlgmr.msra.gmra.mrb[16].mxu1 %vm1840_vm6, %v6237_v34  ;;  %v6281_v34 = vld [vmem:[%s7690_s3 + $0x158] sm:$0xff]  }
 0x3f8   : > { %5565 = vmatpush3.bf16.msra.mxu1 %v6247_v22  ;;  %v6284_v22 = vld [vmem:[%s7690_s3 + $0x160] sm:$0xff]  }
 0x3f9   : > { %5566 = vmatprep.subr.bf16.mxu1 %v6249_v36  ;;  %v6285_v36 = vld [vmem:[%s7690_s3 + $0x128] sm:$0xff]  }
 0x3fc   : > { %5567 = vmatpush3.bf16.msra.mxu1 %v6250_v38  ;;  %v6286_v38 = vld [vmem:[%s7690_s3 + $0xe8] sm:$0xff]  }
 0x3fd   : > { %5568 = vmatprep.subr.bf16.mxu1 %v6252_v39  ;;  %v6287_v39 = vld [vmem:[%s7690_s3 + $0x168] sm:$0xff]  }
 0x400   : > { %5569 = vmatpush3.bf16.msra.mxu1 %v6253_v40  ;;  %v6288_v40 = vld [vmem:[%s7690_s3 + $0x130] sm:$0xff]  }
 0x401   : > { %5570 = vmatprep.subr.bf16.mxu1 %v6255_v41  ;;  %v6289_v41 = vld [vmem:[%s7690_s3 + $0xf0] sm:$0xff]  }
 0x404   : > { %5571 = vmatpush3.bf16.msra.mxu1 %v6256_v42  ;;  %v6290_v42 = vld [vmem:[%s7690_s3 + $0x170] sm:$0xff]  }
 0x405   : > { %5572 = vmatprep.subr.bf16.mxu1 %v6258_v44  ;;  %v6291_v44 = vld [vmem:[%s7690_s3 + $0x138] sm:$0xff]  }
 0x408   : > { %5573 = vmatpush3.bf16.msra.mxu1 %v6259_v45  ;;  %v6292_v45 = vld [vmem:[%s7690_s3 + $0xf8] sm:$0xff]  }
 0x409   : > { %5574 = vmatprep.subr.bf16.mxu1 %v6261_v46  ;;  %v6293_v46 = vld [vmem:[%s7690_s3 + $0x178] sm:$0xff]  }
 0x40c   : > { %5575 = vmatpush3.bf16.msra.mxu1 %v6262_v47  ;;  %v6294_v47 = vld [vmem:[%s7690_s3 + $0x1c0] sm:$0xff]  }
 0x40d   : > { %5576 = vmatprep.subr.bf16.mxu1 %v6264_v61 }
 0x410   : > { %5577 = vmatpush3.bf16.msra.mxu1 %v6265_v62 }
 0x411   : > { %5578 = vmatprep.subr.bf16.mxu1 %v6267_v51 }
 0x414   : > { %5579 = vmatpush3.bf16.msra.mxu1 %v6268_v54 }
 0x415   : > { %5595 = vmatprep.subr.bf16.mxu1 %v6270_v2 }
 0x4ca   : > { %v1878_v48 = vpop.f32.mrb[16].mxu1 }
 0x4cb   : > { %v5909_v49 = vpop.f32.mrb[17].mxu1 }
 0x4cc   : > { %v1881_v50 = vpop.f32.mrb[18].mxu1 }
 0x4cd   : > { %v1885_v53 = vpack.c.bf16 %v1881_v50, %v1878_v48  ;;  %v5910_v55 = vpop.f32.mrb[19].mxu1 }
 0x4cf   : > { %5928 = vmatmul.mubr.bf16.vlgmr.msra.gmra.mrb[32].mxu0 %v1885_v53 }
 0x4d0   : > { %5932 = vmatpush3.bf16.msra.mxu0 %v6248_v52  ;;  %5947 = vmatprep.mubr.msk.bf16.mxu0 %vm6495_vm5, %v6494_v63 }
 0x4d1   : > { %5933 = vmatprep.subr.bf16.mxu0 %v6494_v63 }
 0x4d4   : > { %5934 = vmatpush3.bf16.msra.mxu0 %v6251_v56 }
 0x4d5   : > { %5935 = vmatprep.subr.bf16.mxu0 %v6494_v63 }
 0x4d8   : > { %5936 = vmatpush3.bf16.msra.mxu0 %v6254_v57 }
 0x4d9   : > { %5937 = vmatprep.subr.bf16.mxu0 %v6494_v63 }
 0x4dc   : > { %5938 = vmatpush3.bf16.msra.mxu0 %v6257_v58 }
 0x4dd   : > { %5939 = vmatprep.subr.bf16.mxu0 %v6494_v63 }
 0x4e0   : > { %5940 = vmatpush3.bf16.msra.mxu0 %v6260_v59 }
 0x4e1   : > { %5941 = vmatprep.subr.bf16.mxu0 %v6494_v63 }
 0x4e4   : > { %5942 = vmatpush3.bf16.msra.mxu0 %v6263_v60 }
 0x4e5   : > { %5943 = vmatprep.subr.bf16.mxu0 %v6494_v63 }
 0x4e8   : > { %5944 = vmatpush3.bf16.msra.mxu0 %v6266_v43 }
 0x4e9   : > { %5945 = vmatprep.subr.bf16.mxu0 %v6494_v63 }
 0x4ec   : > { %5946 = vmatpush3.bf16.msra.mxu0 %v6269_v0 }
 0x4ed   : > { %5951 = vmatprep.subr.bf16.mxu0 %v6494_v63 }
 0x5a2   : > { %v7229_v6 = vpop.f32.mrb[32].mxu0 }
 0x5a3   : > { %v5929_v7 = vpop.f32.mrb[33].mxu0  ;;  %v2019_v8 = vrot.slane %v7229_v6, 7  ;;  %v2029_v10 = vrot.slane %v7229_v6, 1 }
 0x5a4   : > { %v7232_v9 = vpop.f32.mrb[34].mxu0 }
 0x5a5   : > { %v2020_v11 = vrot.slane %v7232_v9, 7  ;;  %v2030_v12 = vrot.slane %v7232_v9, 1  ;;  %v5930_v14 = vpop.f32.mrb[35].mxu0  ;;  %v2040_v17 = vpack.c.bf16 %v7232_v9, %v7229_v6 }
 0x5a6   : > { %v6295_v14 = vld [vmem:[%s7690_s3 + $0x180] sm:$0xff]  }
 0x5a7   : > { %v2021_v18 = vsel %vm497_vm0, %v2019_v8, %v2020_v11  ;;  %v2022_v19 = vsel %vm497_vm0, %v2020_v11, %v2019_v8  ;;  %v2031_v20 = vsel %vm518_vm1, %v2029_v10, %v2030_v12  ;;  %v2032_v21 = vsel %vm518_vm1, %v2030_v12, %v2029_v10  ;;  %2266 = vmatprep.mubr.bf16.mxu1 %v2040_v17  ;;  %v6296_v17 = vld [vmem:[%s7690_s3 + $0x200] sm:$0xff]  }
 0x5a8   : > { %v4987_v26 = vpack.c.bf16 %v2021_v18, %v2022_v19  ;;  %v4992_v27 = vpack.c.bf16 %v2032_v21, %v2031_v20  ;;  %v6297_v20 = vld [vmem:[%s7690_s3 + $0x1c8] sm:$0xff]  }
 0x5a9   : > { %v6298_v21 = vld [vmem:[%s7690_s3 + $0x188] sm:$0xff]  }
 0x5aa   : > { %4988 = vmatmul.mubr.msk.bf16.vlgmr.msra.gmra.mrb[20].mxu1 %vm7239_vm11, %v4987_v26  ;;  %5948 = vmatmul.mubr.msk.bf16.vlgmr.msra.gmra.mrb[36].mxu0 %vm7251_vm12, %v4992_v27  ;;  %v6301_v26 = vld [vmem:[%s7690_s3 + $0x190] sm:$0xff]  }
 0x5ab   : > { %5596 = vmatpush3.bf16.msra.mxu1 %v6271_v24  ;;  %5952 = vmatpush3.bf16.msra.mxu0 %v6272_v25  ;;  %v6299_v24 = vld [vmem:[%s7690_s3 + $0x208] sm:$0xff]   ;;  %v6300_v25 = vld [vmem:[%s7690_s3 + $0x1d0] sm:$0xff]  }
 0x5ac   : > { %5597 = vmatprep.subr.bf16.mxu1 %v6273_v28  ;;  %5953 = vmatprep.subr.bf16.mxu0 %v6494_v63  ;;  %v6302_v27 = vld [vmem:[%s7690_s3 + $0x210] sm:$0xff]   ;;  %v6303_v28 = vld [vmem:[%s7690_s3 + $0x1d8] sm:$0xff]  }
 0x5ad   : > { %5967 = vmatprep.mubr.msk.bf16.mxu0 %vm6495_vm5, %v6494_v63 }
 0x5af   : > { %5598 = vmatpush3.bf16.msra.mxu1 %v6274_v29  ;;  %5954 = vmatpush3.bf16.msra.mxu0 %v6275_v30  ;;  %v6304_v29 = vld [vmem:[%s7690_s3 + $0x198] sm:$0xff]  }
 0x5b0   : > { %5599 = vmatprep.subr.bf16.mxu1 %v6276_v31  ;;  %5955 = vmatprep.subr.bf16.mxu0 %v6494_v63  ;;  %v6305_v30 = vld [vmem:[%s7690_s3 + $0x218] sm:$0xff]   ;;  %v6306_v31 = vld [vmem:[%s7690_s3 + $0x1e0] sm:$0xff]  }
 0x5b3   : > { %5600 = vmatpush3.bf16.msra.mxu1 %v6277_v32  ;;  %5956 = vmatpush3.bf16.msra.mxu0 %v6278_v33  ;;  %v6307_v32 = vld [vmem:[%s7690_s3 + $0x1a0] sm:$0xff]  }
 0x5b4   : > { %5601 = vmatprep.subr.bf16.mxu1 %v6279_v1  ;;  %5957 = vmatprep.subr.bf16.mxu0 %v6494_v63  ;;  %v6308_v33 = vld [vmem:[%s7690_s3 + $0x220] sm:$0xff]   ;;  %v6309_v1 = vld [vmem:[%s7690_s3 + $0x1e8] sm:$0xff]  }
 0x5b7   : > { %5602 = vmatpush3.bf16.msra.mxu1 %v6280_v3  ;;  %5958 = vmatpush3.bf16.msra.mxu0 %v6281_v34  ;;  %v6310_v3 = vld [vmem:[%s7690_s3 + $0x1a8] sm:$0xff]  }
 0x5b8   : > { %5959 = vmatprep.subr.bf16.mxu0 %v6494_v63  ;;  %5603 = vmatprep.subr.bf16.mxu1 %v6282_v35  ;;  %v6311_v34 = vld [vmem:[%s7690_s3 + $0x228] sm:$0xff]   ;;  %v6312_v35 = vld [vmem:[%s7690_s3 + $0x1f0] sm:$0xff]  }
 0x5bb   : > { %5604 = vmatpush3.bf16.msra.mxu1 %v6283_v15  ;;  %5960 = vmatpush3.bf16.msra.mxu0 %v6284_v22  ;;  %v6313_v15 = vld [vmem:[%s7690_s3 + $0x1b0] sm:$0xff]  }
 0x5bc   : > { %5961 = vmatprep.subr.bf16.mxu0 %v6494_v63  ;;  %5605 = vmatprep.subr.bf16.mxu1 %v6285_v36  ;;  %v6314_v22 = vld [vmem:[%s7690_s3 + $0x230] sm:$0xff]   ;;  %v6315_v36 = vld [vmem:[%s7690_s3 + $0x1f8] sm:$0xff]  }
 0x5bf   : > { %5606 = vmatpush3.bf16.msra.mxu1 %v6286_v38  ;;  %5962 = vmatpush3.bf16.msra.mxu0 %v6287_v39  ;;  %v6316_v38 = vld [vmem:[%s7690_s3 + $0x1b8] sm:$0xff]  }
 0x5c0   : > { %5963 = vmatprep.subr.bf16.mxu0 %v6494_v63  ;;  %5607 = vmatprep.subr.bf16.mxu1 %v6288_v40  ;;  %v6317_v39 = vld [vmem:[%s7690_s3 + $0x238] sm:$0xff]   ;;  %v6318_v40 = vld [vmem:[%s7690_s3 + $0x280] sm:$0xff]  }
 0x5c3   : > { %5608 = vmatpush3.bf16.msra.mxu1 %v6289_v41  ;;  %5964 = vmatpush3.bf16.msra.mxu0 %v6290_v42 }
 0x5c4   : > { %5609 = vmatprep.subr.bf16.mxu1 %v6291_v44  ;;  %5965 = vmatprep.subr.bf16.mxu0 %v6494_v63 }
 0x5c7   : > { %5610 = vmatpush3.bf16.msra.mxu1 %v6292_v45  ;;  %5966 = vmatpush3.bf16.msra.mxu0 %v6293_v46 }
 0x5c8   : > { %5971 = vmatprep.subr.bf16.mxu0 %v6494_v63  ;;  %5626 = vmatprep.subr.bf16.mxu1 %v6294_v47 }
 0x67d   : > { %v5580_v48 = vpop.f32.mrb[20].mxu1  ;;  %v2309_v49 = vpop.f32.mrb[36].mxu0 }
 0x67e   : > { %v5581_v50 = vpop.f32.mrb[21].mxu1  ;;  %v5949_v52 = vpop.f32.mrb[37].mxu0 }
 0x67f   : > { %v5582_v53 = vadd.f32 %v5581_v50, %v5580_v48  ;;  %v5583_v55 = vpop.f32.mrb[22].mxu1  ;;  %v2312_v56 = vpop.f32.mrb[38].mxu0 }
 0x680   : > { %v5584_v57 = vpop.f32.mrb[23].mxu1  ;;  %v5950_v58 = vpop.f32.mrb[39].mxu0 }
 0x681   : > { %v2310_v59 = vadd.f32 %v5582_v53, %v2309_v49  ;;  %v5585_v60 = vadd.f32 %v5584_v57, %v5583_v55 }
 0x683   : > { %vm2316_vm13 = vcmp.ge.f32.partialorder %v2310_v59, 0.0  ;;  %v2318_v61 = vmul.f32 %v2310_v59, %v6846_v37  ;;  %v2313_v62 = vadd.f32 %v5585_v60, %v2312_v56 }
 0x685   : > { %vm2317_vm14 = vcmp.ge.f32.partialorder %v2313_v62, 0.0  ;;  %v2319_v43 = vmul.f32 %v2313_v62, %v6846_v37  ;;  %v2320_v51 = vsel %vm2316_vm13, %v2310_v59, %v2318_v61 }
 0x686   : > { %v2322_v0 = vrot.slane %v2320_v51, 7  ;;  %v2328_v4 = vrot.slane %v2320_v51, 1 }
 0x687   : > { %v2321_v54 = vsel %vm2317_vm14, %v2313_v62, %v2319_v43 }
 0x688   : > { %v2323_v2 = vrot.slane %v2321_v54, 7  ;;  %v2329_v5 = vrot.slane %v2321_v54, 1  ;;  %v2335_v7 = vpack.c.bf16 %v2321_v54, %v2320_v51  ;;  %v6319_v54 = vld [vmem:[%s7690_s3 + $0x240] sm:$0xff]  }
 0x68a   : > { %2562 = vmatprep.mubr.bf16.mxu1 %v2335_v7  ;;  %v2324_v8 = vsel %vm497_vm0, %v2322_v0, %v2323_v2  ;;  %v2325_v10 = vsel %vm497_vm0, %v2323_v2, %v2322_v0  ;;  %v2330_v11 = vsel %vm518_vm1, %v2328_v4, %v2329_v5  ;;  %v2331_v12 = vsel %vm518_vm1, %v2329_v5, %v2328_v4  ;;  %v6320_v0 = vld [vmem:[%s7690_s3 + $0x2c0] sm:$0xff]   ;;  %v6321_v5 = vld [vmem:[%s7690_s3 + $0x288] sm:$0xff]  }
 0x68b   : > { %v5069_v18 = vpack.c.bf16 %v2324_v8, %v2325_v10  ;;  %v5074_v19 = vpack.c.bf16 %v2331_v12, %v2330_v11  ;;  %v6322_v7 = vld [vmem:[%s7690_s3 + $0x248] sm:$0xff]   ;;  %v6324_v10 = vld [vmem:[%s7690_s3 + $0x290] sm:$0xff]  }
 0x68c   : > { %v6323_v8 = vld [vmem:[%s7690_s3 + $0x2c8] sm:$0xff]   ;;  %v6325_v11 = vld [vmem:[%s7690_s3 + $0x250] sm:$0xff]  }
 0x68d   : > { %5070 = vmatmul.mubr.msk.bf16.vlgmr.msra.gmra.mrb[24].mxu1 %vm7239_vm11, %v5069_v18  ;;  %5968 = vmatmul.mubr.msk.bf16.vlgmr.msra.gmra.mrb[40].mxu0 %vm7251_vm12, %v5074_v19  ;;  %v6326_v12 = vld [vmem:[%s7690_s3 + $0x2d0] sm:$0xff]   ;;  %v6329_v18 = vld [vmem:[%s7690_s3 + $0x2d8] sm:$0xff]   ;;  %v6330_v19 = vld [vmem:[%s7690_s3 + $0x2a0] sm:$0xff]  }
 0x68e   : > { %5627 = vmatpush3.bf16.msra.mxu1 %v6295_v14  ;;  %5972 = vmatpush3.bf16.msra.mxu0 %v6296_v17  ;;  %v6327_v14 = vld [vmem:[%s7690_s3 + $0x298] sm:$0xff]  }
 0x68f   : > { %5628 = vmatprep.subr.bf16.mxu1 %v6297_v20  ;;  %5973 = vmatprep.subr.bf16.mxu0 %v6494_v63  ;;  %v6328_v17 = vld [vmem:[%s7690_s3 + $0x258] sm:$0xff]   ;;  %v6331_v20 = vld [vmem:[%s7690_s3 + $0x260] sm:$0xff]  }
 0x690   : > { %5987 = vmatprep.mubr.msk.bf16.mxu0 %vm6495_vm5, %v6494_v63 }
 0x692   : > { %5629 = vmatpush3.bf16.msra.mxu1 %v6298_v21  ;;  %5974 = vmatpush3.bf16.msra.mxu0 %v6299_v24  ;;  %v6332_v21 = vld [vmem:[%s7690_s3 + $0x2e0] sm:$0xff]   ;;  %v6333_v24 = vld [vmem:[%s7690_s3 + $0x2a8] sm:$0xff]  }
 0x693   : > { %5630 = vmatprep.subr.bf16.mxu1 %v6300_v25  ;;  %5975 = vmatprep.subr.bf16.mxu0 %v6494_v63  ;;  %v6334_v25 = vld [vmem:[%s7690_s3 + $0x268] sm:$0xff]  }
 0x696   : > { %5631 = vmatpush3.bf16.msra.mxu1 %v6301_v26  ;;  %5976 = vmatpush3.bf16.msra.mxu0 %v6302_v27  ;;  %v6335_v26 = vld [vmem:[%s7690_s3 + $0x2e8] sm:$0xff]   ;;  %v6336_v27 = vld [vmem:[%s7690_s3 + $0x2b0] sm:$0xff]  }
 0x697   : > { %5632 = vmatprep.subr.bf16.mxu1 %v6303_v28  ;;  %5977 = vmatprep.subr.bf16.mxu0 %v6494_v63  ;;  %v6337_v28 = vld [vmem:[%s7690_s3 + $0x270] sm:$0xff]  }
 0x69a   : > { %5633 = vmatpush3.bf16.msra.mxu1 %v6304_v29  ;;  %5978 = vmatpush3.bf16.msra.mxu0 %v6305_v30  ;;  %v6338_v29 = vld [vmem:[%s7690_s3 + $0x2f0] sm:$0xff]   ;;  %v6339_v30 = vld [vmem:[%s7690_s3 + $0x2b8] sm:$0xff]  }
 0x69b   : > { %5634 = vmatprep.subr.bf16.mxu1 %v6306_v31  ;;  %5979 = vmatprep.subr.bf16.mxu0 %v6494_v63  ;;  %v6340_v31 = vld [vmem:[%s7690_s3 + $0x278] sm:$0xff]  }
 0x69e   : > { %5635 = vmatpush3.bf16.msra.mxu1 %v6307_v32  ;;  %5980 = vmatpush3.bf16.msra.mxu0 %v6308_v33  ;;  %v6341_v32 = vld [vmem:[%s7690_s3 + $0x2f8] sm:$0xff]  }
 0x69f   : > { %5981 = vmatprep.subr.bf16.mxu0 %v6494_v63  ;;  %5636 = vmatprep.subr.bf16.mxu1 %v6309_v1 }
 0x6a2   : > { %5637 = vmatpush3.bf16.msra.mxu1 %v6310_v3  ;;  %5982 = vmatpush3.bf16.msra.mxu0 %v6311_v34 }
 0x6a3   : > { %5983 = vmatprep.subr.bf16.mxu0 %v6494_v63  ;;  %5638 = vmatprep.subr.bf16.mxu1 %v6312_v35 }
 0x6a6   : > { %5639 = vmatpush3.bf16.msra.mxu1 %v6313_v15  ;;  %5984 = vmatpush3.bf16.msra.mxu0 %v6314_v22 }
 0x6a7   : > { %5985 = vmatprep.subr.bf16.mxu0 %v6494_v63  ;;  %5640 = vmatprep.subr.bf16.mxu1 %v6315_v36 }
 0x6aa   : > { %5641 = vmatpush3.bf16.msra.mxu1 %v6316_v38  ;;  %5986 = vmatpush3.bf16.msra.mxu0 %v6317_v39 }
 0x6ab   : > { %5991 = vmatprep.subr.bf16.mxu0 %v6494_v63  ;;  %5657 = vmatprep.subr.bf16.mxu1 %v6318_v40 }
 0x760   : > { %v5611_v41 = vpop.f32.mrb[24].mxu1  ;;  %v2605_v42 = vpop.f32.mrb[40].mxu0 }
 0x761   : > { %v5612_v44 = vpop.f32.mrb[25].mxu1  ;;  %v5969_v45 = vpop.f32.mrb[41].mxu0 }
 0x762   : > { %v5613_v46 = vadd.f32 %v5612_v44, %v5611_v41  ;;  %v5614_v47 = vpop.f32.mrb[26].mxu1  ;;  %v2608_v48 = vpop.f32.mrb[42].mxu0 }
 0x763   : > { %v5615_v49 = vpop.f32.mrb[27].mxu1  ;;  %v5970_v50 = vpop.f32.mrb[43].mxu0 }
 0x764   : > { %v2606_v52 = vadd.f32 %v5613_v46, %v2605_v42  ;;  %v5616_v53 = vadd.f32 %v5615_v49, %v5614_v47 }
 0x766   : > { %v7438_v55 = vadd.f32 %v2606_v52, %v7229_v6  ;;  %v2609_v56 = vadd.f32 %v5616_v53, %v2608_v48 }
 0x768   : > { %v7441_v57 = vadd.f32 %v2609_v56, %v7232_v9  ;;  %v2614_v58 = vrot.slane %v7438_v55, 7  ;;  %v2620_v59 = vrot.slane %v7438_v55, 1 }
 0x76a   : > { %v2615_v60 = vrot.slane %v7441_v57, 7  ;;  %v2621_v61 = vrot.slane %v7441_v57, 1  ;;  %v2627_v62 = vpack.c.bf16 %v7441_v57, %v7438_v55 }
 0x76c   : > { %2854 = vmatprep.mubr.bf16.mxu1 %v2627_v62  ;;  %v2616_v6 = vsel %vm497_vm0, %v2614_v58, %v2615_v60  ;;  %v2617_v43 = vsel %vm497_vm0, %v2615_v60, %v2614_v58  ;;  %v2622_v9 = vsel %vm518_vm1, %v2620_v59, %v2621_v61  ;;  %v2623_v51 = vsel %vm518_vm1, %v2621_v61, %v2620_v59  ;;  %v6342_v62 = vld [vmem:[%s7693_s6] sm:$0xff]  }
 0x76d   : > { %v5151_v2 = vpack.c.bf16 %v2616_v6, %v2617_v43  ;;  %v5156_v4 = vpack.c.bf16 %v2623_v51, %v2622_v9  ;;  %v6343_v6 = vld [vmem:[%s7693_s6 + $0x8] sm:$0xff]   ;;  %v6346_v43 = vld [vmem:[%s7693_s6 + $0x20] sm:$0xff]   ;;  %v6348_v51 = vld [vmem:[%s7693_s6 + $0x30] sm:$0xff]  }
 0x76e   : > { %v6347_v9 = vld [vmem:[%s7693_s6 + $0x28] sm:$0xff]  }
 0x76f   : > { %5152 = vmatmul.mubr.msk.bf16.vlgmr.msra.gmra.mrb[28].mxu1 %vm7239_vm11, %v5151_v2  ;;  %5988 = vmatmul.mubr.msk.bf16.vlgmr.msra.gmra.mrb[44].mxu0 %vm7251_vm12, %v5156_v4 }
 0x770   : > { %5658 = vmatpush3.bf16.msra.mxu1 %v6319_v54  ;;  %5992 = vmatpush3.bf16.msra.mxu0 %v6320_v0 }
 0x771   : > { %5659 = vmatprep.subr.bf16.mxu1 %v6321_v5  ;;  %5993 = vmatprep.subr.bf16.mxu0 %v6494_v63 }
 0x772   : > { %6007 = vmatprep.mubr.msk.bf16.mxu0 %vm6495_vm5, %v6494_v63 }
 0x774   : > { %5660 = vmatpush3.bf16.msra.mxu1 %v6322_v7  ;;  %5994 = vmatpush3.bf16.msra.mxu0 %v6323_v8 }
 0x775   : > { %5661 = vmatprep.subr.bf16.mxu1 %v6324_v10  ;;  %5995 = vmatprep.subr.bf16.mxu0 %v6494_v63 }
 0x778   : > { %5662 = vmatpush3.bf16.msra.mxu1 %v6325_v11  ;;  %5996 = vmatpush3.bf16.msra.mxu0 %v6326_v12 }
 0x779   : > { %5663 = vmatprep.subr.bf16.mxu1 %v6327_v14  ;;  %5997 = vmatprep.subr.bf16.mxu0 %v6494_v63 }
 0x77c   : > { %5664 = vmatpush3.bf16.msra.mxu1 %v6328_v17  ;;  %5998 = vmatpush3.bf16.msra.mxu0 %v6329_v18 }
 0x77d   : > { %5999 = vmatprep.subr.bf16.mxu0 %v6494_v63  ;;  %5665 = vmatprep.subr.bf16.mxu1 %v6330_v19 }
 0x780   : > { %5666 = vmatpush3.bf16.msra.mxu1 %v6331_v20  ;;  %6000 = vmatpush3.bf16.msra.mxu0 %v6332_v21  ;;  %v3204_v21 = vld [vmem:[%s7695_s8] sm:$0xf] }
 0x781   : > { %6001 = vmatprep.subr.bf16.mxu0 %v6494_v63  ;;  %5667 = vmatprep.subr.bf16.mxu1 %v6333_v24  ;;  %v6349_v24 = vld [vmem:[%s7693_s6 + $0x38] sm:$0xff]  }
 0x784   : > { %5668 = vmatpush3.bf16.msra.mxu1 %v6334_v25  ;;  %6002 = vmatpush3.bf16.msra.mxu0 %v6335_v26  ;;  %v6351_v25 = vld [vmem:[#allocation3] sm:$0xff]   ;;  %v6353_v26 = vld [vmem:[#allocation3 + $0x48] sm:$0xff]  }
 0x785   : > { %6003 = vmatprep.subr.bf16.mxu0 %v6494_v63  ;;  %5669 = vmatprep.subr.bf16.mxu1 %v6336_v27  ;;  %v6356_v27 = vld [vmem:[#allocation3 + $0x50] sm:$0xff]  }
 0x788   : > { %5670 = vmatpush3.bf16.msra.mxu1 %v6337_v28  ;;  %6004 = vmatpush3.bf16.msra.mxu0 %v6338_v29  ;;  %v6357_v28 = vld [vmem:[#allocation3 + $0x10] sm:$0xff]   ;;  %v6359_v29 = vld [vmem:[#allocation3 + $0x58] sm:$0xff]  }
 0x789   : > { %5671 = vmatprep.subr.bf16.mxu1 %v6339_v30  ;;  %6005 = vmatprep.subr.bf16.mxu0 %v6494_v63  ;;  %v6360_v30 = vld [vmem:[#allocation3 + $0x18] sm:$0xff]  }
 0x78c   : > { %5672 = vmatpush3.bf16.msra.mxu1 %v6340_v31  ;;  %6006 = vmatpush3.bf16.msra.mxu0 %v6341_v32  ;;  %v6362_v31 = vld [vmem:[#allocation3 + $0x60] sm:$0xff]  }
 0x78d   : > { %6011 = vmatprep.subr.bf16.mxu0 %v6494_v63  ;;  %6017 = vmatprep.subr.bf16.mxu1 %v6494_v63  ;;  %v6363_v32 = vld [vmem:[#allocation3 + $0x20] sm:$0xff]  }
 0x842   : > { %v5642_v33 = vpop.f32.mrb[28].mxu1  ;;  %v2897_v1 = vpop.f32.mrb[44].mxu0 }
 0x843   : > { %v5643_v3 = vpop.f32.mrb[29].mxu1  ;;  %v5989_v34 = vpop.f32.mrb[45].mxu0 }
 0x844   : > { %v5644_v35 = vadd.f32 %v5643_v3, %v5642_v33  ;;  %v5645_v15 = vpop.f32.mrb[30].mxu1  ;;  %v2900_v22 = vpop.f32.mrb[46].mxu0  ;;  %v6365_v33 = vld [vmem:[#allocation3 + $0x68] sm:$0xff]   ;;  %v6368_v3 = vld [vmem:[#allocation3 + $0x70] sm:$0xff]  }
 0x845   : > { %v5646_v36 = vpop.f32.mrb[31].mxu1  ;;  %v5990_v38 = vpop.f32.mrb[47].mxu0  ;;  %v6369_v34 = vld [vmem:[#allocation3 + $0x30] sm:$0xff]  }
 0x846   : > { %v2898_v39 = vadd.f32 %v5644_v35, %v2897_v1  ;;  %v5647_v40 = vadd.f32 %v5646_v36, %v5645_v15  ;;  %v6366_v1 = vld [vmem:[#allocation3 + $0x28] sm:$0xff]   ;;  %v6352_v15 = vld [vmem:[#allocation3 + $0x80] sm:$0xff]  }
 0x848   : > { %vm2904_vm15 = vcmp.ge.f32.partialorder %v2898_v39, 0.0  ;;  %v2906_v41 = vmul.f32 %v2898_v39, %v6846_v37  ;;  %v2901_v42 = vadd.f32 %v5647_v40, %v2900_v22  ;;  %v6355_v40 = vld [vmem:[#allocation3 + $0x88] sm:$0xff]  }
 0x84a   : > { %vm2905_vm2 = vcmp.ge.f32.partialorder %v2901_v42, 0.0  ;;  %v2907_v44 = vmul.f32 %v2901_v42, %v6846_v37  ;;  %v2908_v45 = vsel %vm2904_vm15, %v2898_v39, %v2906_v41  ;;  %v6358_v41 = vld [vmem:[#allocation3 + $0x90] sm:$0xff]  }
 0x84b   : > { %v2910_v47 = vrot.slane %v2908_v45, 7  ;;  %v2916_v49 = vrot.slane %v2908_v45, 1 }
 0x84c   : > { %v2909_v46 = vsel %vm2905_vm2, %v2901_v42, %v2907_v44  ;;  %v6361_v42 = vld [vmem:[#allocation3 + $0x98] sm:$0xff]   ;;  %v6364_v44 = vld [vmem:[#allocation3 + $0xa0] sm:$0xff]  }
 0x84d   : > { %v2911_v48 = vrot.slane %v2909_v46, 7  ;;  %v2917_v50 = vrot.slane %v2909_v46, 1  ;;  %v2923_v52 = vpack.c.bf16 %v2909_v46, %v2908_v45  ;;  %v6367_v45 = vld [vmem:[#allocation3 + $0xa8] sm:$0xff]   ;;  %v6370_v46 = vld [vmem:[#allocation3 + $0xb0] sm:$0xff]  }
 0x84f   : > { %3150 = vmatprep.mubr.bf16.mxu1 %v2923_v52  ;;  %v2912_v53 = vsel %vm497_vm0, %v2910_v47, %v2911_v48  ;;  %v2913_v56 = vsel %vm497_vm0, %v2911_v48, %v2910_v47  ;;  %v2918_v58 = vsel %vm518_vm1, %v2916_v49, %v2917_v50  ;;  %v2919_v59 = vsel %vm518_vm1, %v2917_v50, %v2916_v49  ;;  %v6371_v47 = vld [vmem:[#allocation3 + $0x78] sm:$0xff]   ;;  %v6374_v50 = vld [vmem:[#allocation3 + $0x100] sm:$0xff]  }
 0x850   : > { %v5233_v60 = vpack.c.bf16 %v2912_v53, %v2913_v56  ;;  %v5238_v61 = vpack.c.bf16 %v2919_v59, %v2918_v58  ;;  %vm3206_vm0 = vcmask 130048   ;;  %v6372_v48 = vld [vmem:[#allocation3 + $0x38] sm:$0xff]   ;;  %v3359_v52 = vand.u32 3, %v6641_v13  ;;  %v6375_v13 = vld [vmem:[#allocation3 + $0xc0] sm:$0xff]  }
 0x851   : > { %v6373_v49 = vld [vmem:[#allocation3 + $0xb8] sm:$0xff]  }
 0x852   : > { %5234 = vmatmul.mubr.msk.bf16.vlgmr.msra.gmra.mrb[32].mxu1 %vm7239_vm11, %v5233_v60  ;;  %6008 = vmatmul.mubr.msk.bf16.vlgmr.msra.gmra.mrb[48].mxu0 %vm7251_vm12, %v5238_v61  ;;  %vm5398_vm1 = vcmp.ne.s32.totalorder %v3359_v52, 0  ;;  %vm5399_vm3 = vcmp.ne.s32.totalorder %v3359_v52, 3  ;;  %v6408_v52 = vld [vmem:[#allocation3 + $0x198] sm:$0xff]  }
 0x853   : > { %6013 = vmatprep.mubr.msk.bf16.mxu0 %vm6495_vm5, %v6494_v63  ;;  %6033 = vmatprep.mubr.msk.bf16.mxu1 %vm6495_vm5, %v6494_v63  ;;  %vm7617_vm4 = vmpackc.low %vm5398_vm1, %vm5398_vm1 }
 0x854   : > { %6018 = vmatpush3.bf16.msra.mxu1 %v6342_v62  ;;  %vm7621_vm6 = vmpackc.low %vm5399_vm3, %vm5399_vm3 }
 0x855   : > { %6019 = vmatprep.subr.bf16.mxu1 %v6494_v63 }
 0x858   : > { %6020 = vmatpush3.bf16.msra.mxu1 %v6343_v6 }
 0x859   : > { %6021 = vmatprep.subr.bf16.mxu1 %v6494_v63 }
 0x85c   : > { %6022 = vmatpush3.bf16.msra.mxu1 %v6344_v16  ;;  %v6376_v16 = vld [vmem:[#allocation3 + $0x140] sm:$0xff]  }
 0x85d   : > { %6023 = vmatprep.subr.bf16.mxu1 %v6494_v63 }
 0x860   : > { %6024 = vmatpush3.bf16.msra.mxu1 %v6345_v23 }
 0x861   : > { %6025 = vmatprep.subr.bf16.mxu1 %v6494_v63 }
 0x864   : > { %6026 = vmatpush3.bf16.msra.mxu1 %v6346_v43 }
 0x865   : > { %6027 = vmatprep.subr.bf16.mxu1 %v6494_v63 }
 0x868   : > { %6028 = vmatpush3.bf16.msra.mxu1 %v6347_v9 }
 0x869   : > { %6029 = vmatprep.subr.bf16.mxu1 %v6494_v63 }
 0x86c   : > { %6030 = vmatpush3.bf16.msra.mxu1 %v6348_v51  ;;  %v6377_v51 = vld [vmem:[#allocation3 + $0x108] sm:$0xff]  }
 0x86d   : > { %6031 = vmatprep.subr.bf16.mxu1 %v6494_v63 }
 0x870   : > { %6032 = vmatpush3.bf16.msra.mxu1 %v6349_v24  ;;  %v6394_v24 = vld [vmem:[#allocation3 + $0x170] sm:$0xff]  }
 0x871   : > { %6037 = vmatprep.subr.bf16.mxu1 %v6494_v63 }
 0x925   : > { %v5673_v54 = vpop.f32.mrb[32].mxu1  ;;  %v3193_v0 = vpop.f32.mrb[48].mxu0 }
 0x926   : > { %v5674_v2 = vpop.f32.mrb[33].mxu1  ;;  %v6009_v4 = vpop.f32.mrb[49].mxu0 }
 0x927   : > { %v5675_v5 = vadd.f32 %v5674_v2, %v5673_v54  ;;  %v5676_v7 = vpop.f32.mrb[34].mxu1  ;;  %v3196_v8 = vpop.f32.mrb[50].mxu0  ;;  %v6378_v54 = vld [vmem:[#allocation3 + $0xc8] sm:$0xff]   ;;  %v6380_v2 = vld [vmem:[#allocation3 + $0x110] sm:$0xff]  }
 0x928   : > { %v5677_v10 = vpop.f32.mrb[35].mxu1  ;;  %v6010_v11 = vpop.f32.mrb[51].mxu0  ;;  %v6381_v4 = vld [vmem:[#allocation3 + $0xd0] sm:$0xff]  }
 0x929   : > { %v3194_v12 = vadd.f32 %v5675_v5, %v3193_v0  ;;  %v5678_v14 = vadd.f32 %v5677_v10, %v5676_v7  ;;  %v6379_v0 = vld [vmem:[#allocation3 + $0x148] sm:$0xff]   ;;  %v6382_v5 = vld [vmem:[#allocation3 + $0x150] sm:$0xff]   ;;  %v6383_v7 = vld [vmem:[#allocation3 + $0x118] sm:$0xff]  }
 0x92a   : > { %v6385_v10 = vld [vmem:[#allocation3 + $0x158] sm:$0xff]   ;;  %v6386_v11 = vld [vmem:[#allocation3 + $0x120] sm:$0xff]  }
 0x92b   : > { %v3200_v17 = vadd.f32 %v3194_v12, %v7438_v55  ;;  %v3197_v18 = vadd.f32 %v5678_v14, %v3196_v8  ;;  %v6350_v55 = vld [vmem:[#allocation3 + $0x40] sm:$0xff]   ;;  %v6384_v8 = vld [vmem:[#allocation3 + $0xd8] sm:$0xff]  }
 0x92c   : > { %v6387_v12 = vld [vmem:[#allocation3 + $0xe0] sm:$0xff]  }
 0x92d   : > { %3202 = vst [vmem:[%s421_s29] sm:$0xff] %v3200_v17  ;;  %v3201_v19 = vadd.f32 %v3197_v18, %v7441_v57  ;;  %v6354_v57 = vld [vmem:[#allocation3 + $0x8] sm:$0xff]   ;;  %v6388_v14 = vld [vmem:[#allocation3 + $0x160] sm:$0xff]  }
 0x92e   : > { %v6390_v18 = vld [vmem:[#allocation3 + $0xe8] sm:$0xff]  }
 0x92f   : > { %3203 = vst [vmem:[%s421_s29 + $0x8] sm:$0xff] %v3201_v19  ;;  %v3205_v20 = vpack.c.bf16 %v3201_v19, %v3200_v17  ;;  %v6389_v17 = vld [vmem:[#allocation3 + $0x128] sm:$0xff]  }
 0x930   : > { %v6391_v19 = vld [vmem:[#allocation3 + $0x168] sm:$0xff]  }
 0x931   : > { %6012 = vmatpush3.bf16.msra.mxu0 %v3205_v20  ;;  %v6392_v20 = vld [vmem:[#allocation3 + $0x130] sm:$0xff]  }
 0x932   : > { %5699 = vmatprep.subr.bf16.mxu0 %v6350_v55  ;;  %v6395_v55 = vld [vmem:[#allocation3 + $0x138] sm:$0xff]  }
 0x934   : > { %6014 = vmatmul.mubr.msk.bf16.vlgmr.msra.gmra.mrb[52].mxu0 %vm3206_vm0, %v3204_v21  ;;  %v6393_v21 = vld [vmem:[#allocation3 + $0xf0] sm:$0xff]  }
 0x935   : > { %5700 = vmatpush3.bf16.msra.mxu0 %v6351_v25  ;;  %v6396_v25 = vld [vmem:[#allocation3 + $0xf8] sm:$0xff]  }
 0x936   : > { %5701 = vmatprep.subr.bf16.mxu0 %v6353_v26  ;;  %v6397_v26 = vld [vmem:[#allocation3 + $0x178] sm:$0xff]  }
 0x939   : > { %5702 = vmatpush3.bf16.msra.mxu0 %v6354_v57  ;;  %v6398_v57 = vld [vmem:[#allocation3 + $0x1c0] sm:$0xff]  }
 0x93a   : > { %5703 = vmatprep.subr.bf16.mxu0 %v6356_v27 }
 0x93d   : > { %5704 = vmatpush3.bf16.msra.mxu0 %v6357_v28 }
 0x93e   : > { %5705 = vmatprep.subr.bf16.mxu0 %v6359_v29 }
 0x941   : > { %5706 = vmatpush3.bf16.msra.mxu0 %v6360_v30 }
 0x942   : > { %5707 = vmatprep.subr.bf16.mxu0 %v6362_v31 }
 0x945   : > { %5708 = vmatpush3.bf16.msra.mxu0 %v6363_v32 }
 0x946   : > { %5709 = vmatprep.subr.bf16.mxu0 %v6365_v33 }
 0x949   : > { %5710 = vmatpush3.bf16.msra.mxu0 %v6366_v1 }
 0x94a   : > { %5711 = vmatprep.subr.bf16.mxu0 %v6368_v3 }
 0x94d   : > { %5712 = vmatpush3.bf16.msra.mxu0 %v6369_v34 }
 0x94e   : > { %5713 = vmatprep.subr.bf16.mxu0 %v6371_v47  ;;  %v6404_v47 = vld [vmem:[#allocation3 + $0x1d0] sm:$0xff]  }
 0x951   : > { %5714 = vmatpush3.bf16.msra.mxu0 %v6372_v48  ;;  %v6405_v48 = vld [vmem:[#allocation3 + $0x190] sm:$0xff]  }
 0x952   : > { %5730 = vmatprep.subr.bf16.mxu0 %v6374_v50  ;;  %v6407_v50 = vld [vmem:[#allocation3 + $0x1d8] sm:$0xff]  }
 0xa07   : > { %v3244_v35 = vpop.f32.mrb[52].mxu0 }
 0xa08   : > { %v3250_v22 = vpack.c.bf16 %v3244_v35, %v3244_v35  ;;  %v6015_v36 = vpop.f32.mrb[53].mxu0 }
 0xa09   : > { %v3247_v38 = vpop.f32.mrb[54].mxu0 }
 0xa0a   : > { %6034 = vmatmul.mubr.bf16.vlgmr.msra.gmra.mrb[36].mxu1 %v3250_v22  ;;  %v6016_v39 = vpop.f32.mrb[55].mxu0 }
 0xa0b   : > { %6038 = vmatpush3.bf16.msra.mxu1 %v6352_v15  ;;  %6053 = vmatprep.mubr.msk.bf16.mxu1 %vm6495_vm5, %v6494_v63  ;;  %v6399_v39 = vld [vmem:[#allocation3 + $0x180] sm:$0xff]  }
 0xa0c   : > { %6039 = vmatprep.subr.bf16.mxu1 %v6494_v63 }
 0xa0f   : > { %6040 = vmatpush3.bf16.msra.mxu1 %v6355_v40  ;;  %v6400_v40 = vld [vmem:[#allocation3 + $0x200] sm:$0xff]  }
 0xa10   : > { %6041 = vmatprep.subr.bf16.mxu1 %v6494_v63 }
 0xa13   : > { %6042 = vmatpush3.bf16.msra.mxu1 %v6358_v41 }
 0xa14   : > { %6043 = vmatprep.subr.bf16.mxu1 %v6494_v63 }
 0xa17   : > { %6044 = vmatpush3.bf16.msra.mxu1 %v6361_v42 }
 0xa18   : > { %6045 = vmatprep.subr.bf16.mxu1 %v6494_v63 }
 0xa1b   : > { %6046 = vmatpush3.bf16.msra.mxu1 %v6364_v44  ;;  %v6401_v44 = vld [vmem:[#allocation3 + $0x1c8] sm:$0xff]  }
 0xa1c   : > { %6047 = vmatprep.subr.bf16.mxu1 %v6494_v63 }
 0xa1f   : > { %6048 = vmatpush3.bf16.msra.mxu1 %v6367_v45  ;;  %v6402_v45 = vld [vmem:[#allocation3 + $0x188] sm:$0xff]  }
 0xa20   : > { %6049 = vmatprep.subr.bf16.mxu1 %v6494_v63 }
 0xa23   : > { %6050 = vmatpush3.bf16.msra.mxu1 %v6370_v46  ;;  %v6403_v46 = vld [vmem:[#allocation3 + $0x208] sm:$0xff]  }
 0xa24   : > { %6051 = vmatprep.subr.bf16.mxu1 %v6494_v63 }
 0xa27   : > { %6052 = vmatpush3.bf16.msra.mxu1 %v6373_v49  ;;  %v6406_v49 = vld [vmem:[#allocation3 + $0x210] sm:$0xff]  }
 0xa28   : > { %6057 = vmatprep.subr.bf16.mxu1 %v6494_v63 }
 0xadd   : > { %v7611_v53 = vpop.f32.mrb[36].mxu1 }
 0xade   : > { %v3369_v56 = vrot.slane %v7611_v53, 7  ;;  %v3373_v58 = vrot.slane %v7611_v53, 1  ;;  %v6035_v59 = vpop.f32.mrb[37].mxu1  ;;  %v3378_v60 = vpack.c.bf16 %v7611_v53, %v7611_v53 }
 0xadf   : > { %v3352_v62 = vpop.f32.mrb[38].mxu1  ;;  %v6411_v59 = vld [vmem:[#allocation3 + $0x1a0] sm:$0xff]  }
 0xae0   : > { %v5276_v23 = vpack.c.bf16 %v3369_v56, %v3369_v56  ;;  %v5281_v43 = vpack.c.bf16 %v3373_v58, %v3373_v58  ;;  %3604 = vmatprep.mubr.bf16.mxu0 %v3378_v60  ;;  %v6036_v9 = vpop.f32.mrb[39].mxu1  ;;  %v6409_v56 = vld [vmem:[#allocation3 + $0x218] sm:$0xff]   ;;  %v6410_v58 = vld [vmem:[#allocation3 + $0x1e0] sm:$0xff]   ;;  %v6413_v62 = vld [vmem:[#allocation3 + $0x1e8] sm:$0xff]  }
 0xae1   : > { %v6412_v60 = vld [vmem:[#allocation3 + $0x220] sm:$0xff]   ;;  %v6418_v9 = vld [vmem:[#allocation3 + $0x230] sm:$0xff]  }
 0xae2   : > { %5277 = vmatmul.mubr.msk.bf16.vlgmr.msra.gmra.mrb[56].mxu0 %vm7617_vm4, %v5276_v23  ;;  %6054 = vmatmul.mubr.msk.bf16.vlgmr.msra.gmra.mrb[40].mxu1 %vm7621_vm6, %v5281_v43  ;;  %v6416_v23 = vld [vmem:[#allocation3 + $0x1f0] sm:$0xff]  }
 0xae3   : > { %5731 = vmatpush3.bf16.msra.mxu0 %v6375_v13  ;;  %6058 = vmatpush3.bf16.msra.mxu1 %v6376_v16  ;;  %v6414_v13 = vld [vmem:[#allocation3 + $0x1a8] sm:$0xff]   ;;  %v6417_v43 = vld [vmem:[#allocation3 + $0x1b0] sm:$0xff]  }
 0xae4   : > { %5732 = vmatprep.subr.bf16.mxu0 %v6377_v51  ;;  %6059 = vmatprep.subr.bf16.mxu1 %v6494_v63  ;;  %v6415_v16 = vld [vmem:[#allocation3 + $0x228] sm:$0xff]   ;;  %v6419_v51 = vld [vmem:[#allocation3 + $0x1f8] sm:$0xff]  }
 0xae5   : > { %6073 = vmatprep.mubr.msk.bf16.mxu1 %vm6495_vm5, %v6494_v63 }
 0xae7   : > { %5733 = vmatpush3.bf16.msra.mxu0 %v6378_v54  ;;  %6060 = vmatpush3.bf16.msra.mxu1 %v6379_v0  ;;  %v6420_v54 = vld [vmem:[#allocation3 + $0x1b8] sm:$0xff]  }
 0xae8   : > { %5734 = vmatprep.subr.bf16.mxu0 %v6380_v2  ;;  %6061 = vmatprep.subr.bf16.mxu1 %v6494_v63  ;;  %v6421_v0 = vld [vmem:[#allocation3 + $0x238] sm:$0xff]   ;;  %v6422_v2 = vld [vmem:[#allocation3 + $0x280] sm:$0xff]  }
 0xaeb   : > { %5735 = vmatpush3.bf16.msra.mxu0 %v6381_v4  ;;  %6062 = vmatpush3.bf16.msra.mxu1 %v6382_v5 }
 0xaec   : > { %5736 = vmatprep.subr.bf16.mxu0 %v6383_v7  ;;  %6063 = vmatprep.subr.bf16.mxu1 %v6494_v63 }
 0xaef   : > { %5737 = vmatpush3.bf16.msra.mxu0 %v6384_v8  ;;  %6064 = vmatpush3.bf16.msra.mxu1 %v6385_v10 }
 0xaf0   : > { %5738 = vmatprep.subr.bf16.mxu0 %v6386_v11  ;;  %6065 = vmatprep.subr.bf16.mxu1 %v6494_v63 }
 0xaf3   : > { %5739 = vmatpush3.bf16.msra.mxu0 %v6387_v12  ;;  %6066 = vmatpush3.bf16.msra.mxu1 %v6388_v14 }
 0xaf4   : > { %6067 = vmatprep.subr.bf16.mxu1 %v6494_v63  ;;  %5740 = vmatprep.subr.bf16.mxu0 %v6389_v17 }
 0xaf7   : > { %5741 = vmatpush3.bf16.msra.mxu0 %v6390_v18  ;;  %6068 = vmatpush3.bf16.msra.mxu1 %v6391_v19 }
 0xaf8   : > { %6069 = vmatprep.subr.bf16.mxu1 %v6494_v63  ;;  %5742 = vmatprep.subr.bf16.mxu0 %v6392_v20 }
 0xafb   : > { %5743 = vmatpush3.bf16.msra.mxu0 %v6393_v21  ;;  %6070 = vmatpush3.bf16.msra.mxu1 %v6394_v24 }
 0xafc   : > { %6071 = vmatprep.subr.bf16.mxu1 %v6494_v63  ;;  %5744 = vmatprep.subr.bf16.mxu0 %v6395_v55  ;;  %v6423_v55 = vld [vmem:[#allocation3 + $0x240] sm:$0xff]  }
 0xaff   : > { %5745 = vmatpush3.bf16.msra.mxu0 %v6396_v25  ;;  %6072 = vmatpush3.bf16.msra.mxu1 %v6397_v26  ;;  %v6424_v25 = vld [vmem:[#allocation3 + $0x2c0] sm:$0xff]  }
 0xb00   : > { %6077 = vmatprep.subr.bf16.mxu1 %v6494_v63  ;;  %5761 = vmatprep.subr.bf16.mxu0 %v6398_v57 }
 0xbb5   : > { %v5715_v27 = vpop.f32.mrb[56].mxu0  ;;  %v3646_v28 = vpop.f32.mrb[40].mxu1 }
 0xbb6   : > { %v5716_v29 = vpop.f32.mrb[57].mxu0  ;;  %v6055_v30 = vpop.f32.mrb[41].mxu1 }
 0xbb7   : > { %v5717_v31 = vadd.f32 %v5716_v29, %v5715_v27  ;;  %v5718_v32 = vpop.f32.mrb[58].mxu0  ;;  %v3649_v33 = vpop.f32.mrb[42].mxu1  ;;  %v6425_v27 = vld [vmem:[#allocation3 + $0x288] sm:$0xff]   ;;  %v6428_v29 = vld [vmem:[#allocation3 + $0x290] sm:$0xff]  }
 0xbb8   : > { %v5719_v1 = vpop.f32.mrb[59].mxu0  ;;  %v6056_v3 = vpop.f32.mrb[43].mxu1  ;;  %v6429_v30 = vld [vmem:[#allocation3 + $0x250] sm:$0xff]   ;;  %v6431_v32 = vld [vmem:[#allocation3 + $0x298] sm:$0xff]  }
 0xbb9   : > { %v3647_v34 = vadd.f32 %v5717_v31, %v3646_v28  ;;  %v6427_v28 = vld [vmem:[#allocation3 + $0x2c8] sm:$0xff]   ;;  %v6430_v31 = vld [vmem:[#allocation3 + $0x2d0] sm:$0xff]   ;;  %v6432_v33 = vld [vmem:[#allocation3 + $0x258] sm:$0xff]  }
 0xbba   : > { %v6433_v1 = vld [vmem:[#allocation3 + $0x2d8] sm:$0xff]   ;;  %v6434_v3 = vld [vmem:[#allocation3 + $0x2a0] sm:$0xff]  }
 0xbbb   : > { %vm3652_vm7 = vcmp.ge.f32.partialorder %v3647_v34, 0.0  ;;  %v3653_v35 = vmul.f32 %v3647_v34, %v6846_v37 }
 0xbbd   : > { %v3654_v15 = vsel %vm3652_vm7, %v3647_v34, %v3653_v35  ;;  %v6435_v34 = vld [vmem:[#allocation3 + $0x260] sm:$0xff]  }
 0xbbe   : > { %v3655_v22 = vrot.slane %v3654_v15, 7  ;;  %v3657_v36 = vrot.slane %v3654_v15, 1  ;;  %v3660_v38 = vpack.c.bf16 %v3654_v15, %v3654_v15  ;;  %v6436_v35 = vld [vmem:[#allocation3 + $0x2e0] sm:$0xff]   ;;  %v6437_v15 = vld [vmem:[#allocation3 + $0x2a8] sm:$0xff]  }
 0xbc0   : > { %v5310_v41 = vpack.c.bf16 %v3655_v22, %v3655_v22  ;;  %v5315_v42 = vpack.c.bf16 %v3657_v36, %v3657_v36  ;;  %3887 = vmatprep.mubr.bf16.mxu0 %v3660_v38  ;;  %v6438_v22 = vld [vmem:[#allocation3 + $0x268] sm:$0xff]   ;;  %v6440_v38 = vld [vmem:[#allocation3 + $0x2b0] sm:$0xff]  }
 0xbc1   : > { %v6439_v36 = vld [vmem:[#allocation3 + $0x2e8] sm:$0xff]  }
 0xbc2   : > { %5311 = vmatmul.mubr.msk.bf16.vlgmr.msra.gmra.mrb[60].mxu0 %vm7617_vm4, %v5310_v41  ;;  %6074 = vmatmul.mubr.msk.bf16.vlgmr.msra.gmra.mrb[44].mxu1 %vm7621_vm6, %v5315_v42  ;;  %v6443_v41 = vld [vmem:[#allocation3 + $0x2b8] sm:$0xff]  }
 0xbc3   : > { %5762 = vmatpush3.bf16.msra.mxu0 %v6399_v39  ;;  %6078 = vmatpush3.bf16.msra.mxu1 %v6400_v40  ;;  %v6441_v39 = vld [vmem:[#allocation3 + $0x270] sm:$0xff]   ;;  %v6444_v42 = vld [vmem:[#allocation3 + $0x278] sm:$0xff]  }
 0xbc4   : > { %5763 = vmatprep.subr.bf16.mxu0 %v6401_v44  ;;  %6079 = vmatprep.subr.bf16.mxu1 %v6494_v63  ;;  %v6442_v40 = vld [vmem:[#allocation3 + $0x2f0] sm:$0xff]   ;;  %v6445_v44 = vld [vmem:[#allocation3 + $0x2f8] sm:$0xff]  }
 0xbc5   : > { %6093 = vmatprep.mubr.msk.bf16.mxu1 %vm6495_vm5, %v6494_v63 }
 0xbc7   : > { %5764 = vmatpush3.bf16.msra.mxu0 %v6402_v45  ;;  %6080 = vmatpush3.bf16.msra.mxu1 %v6403_v46 }
 0xbc8   : > { %5765 = vmatprep.subr.bf16.mxu0 %v6404_v47  ;;  %6081 = vmatprep.subr.bf16.mxu1 %v6494_v63 }
 0xbcb   : > { %5766 = vmatpush3.bf16.msra.mxu0 %v6405_v48  ;;  %6082 = vmatpush3.bf16.msra.mxu1 %v6406_v49 }
 0xbcc   : > { %5767 = vmatprep.subr.bf16.mxu0 %v6407_v50  ;;  %6083 = vmatprep.subr.bf16.mxu1 %v6494_v63 }
 0xbcf   : > { %5768 = vmatpush3.bf16.msra.mxu0 %v6408_v52  ;;  %6084 = vmatpush3.bf16.msra.mxu1 %v6409_v56 }
 0xbd0   : > { %5769 = vmatprep.subr.bf16.mxu0 %v6410_v58  ;;  %6085 = vmatprep.subr.bf16.mxu1 %v6494_v63 }
 0xbd3   : > { %5770 = vmatpush3.bf16.msra.mxu0 %v6411_v59  ;;  %6086 = vmatpush3.bf16.msra.mxu1 %v6412_v60 }
 0xbd4   : > { %6087 = vmatprep.subr.bf16.mxu1 %v6494_v63  ;;  %5771 = vmatprep.subr.bf16.mxu0 %v6413_v62 }
 0xbd7   : > { %5772 = vmatpush3.bf16.msra.mxu0 %v6414_v13  ;;  %6088 = vmatpush3.bf16.msra.mxu1 %v6415_v16 }
 0xbd8   : > { %6089 = vmatprep.subr.bf16.mxu1 %v6494_v63  ;;  %5773 = vmatprep.subr.bf16.mxu0 %v6416_v23 }
 0xbdb   : > { %5774 = vmatpush3.bf16.msra.mxu0 %v6417_v43  ;;  %6090 = vmatpush3.bf16.msra.mxu1 %v6418_v9 }
 0xbdc   : > { %6091 = vmatprep.subr.bf16.mxu1 %v6494_v63  ;;  %5775 = vmatprep.subr.bf16.mxu0 %v6419_v51 }
 0xbdf   : > { %5776 = vmatpush3.bf16.msra.mxu0 %v6420_v54  ;;  %6092 = vmatpush3.bf16.msra.mxu1 %v6421_v0 }
 0xbe0   : > { %6097 = vmatprep.subr.bf16.mxu1 %v6494_v63  ;;  %5792 = vmatprep.subr.bf16.mxu0 %v6422_v2 }
 0xc95   : > { %v5746_v4 = vpop.f32.mrb[60].mxu0  ;;  %v3929_v5 = vpop.f32.mrb[44].mxu1 }
 0xc96   : > { %v5747_v7 = vpop.f32.mrb[61].mxu0  ;;  %v6075_v8 = vpop.f32.mrb[45].mxu1 }
 0xc97   : > { %v5748_v10 = vadd.f32 %v5747_v7, %v5746_v4  ;;  %v5749_v11 = vpop.f32.mrb[62].mxu0  ;;  %v3932_v12 = vpop.f32.mrb[46].mxu1 }
 0xc98   : > { %v5750_v14 = vpop.f32.mrb[63].mxu0  ;;  %v6076_v17 = vpop.f32.mrb[47].mxu1 }
 0xc99   : > { %v3930_v18 = vadd.f32 %v5748_v10, %v3929_v5 }
 0xc9b   : > { %v7655_v19 = vadd.f32 %v3930_v18, %v7611_v53  ;;  %v6426_v53 = vld [vmem:[#allocation3 + $0x248] sm:$0xff]  }
 0xc9d   : > { %v3941_v20 = vpack.c.bf16 %v7655_v19, %v7655_v19  ;;  %v3936_v21 = vrot.slane %v7655_v19, 7  ;;  %v3938_v24 = vrot.slane %v7655_v19, 1 }
 0xc9f   : > { %4168 = vmatprep.mubr.bf16.mxu0 %v3941_v20  ;;  %v5344_v26 = vpack.c.bf16 %v3936_v21, %v3936_v21  ;;  %v5349_v57 = vpack.c.bf16 %v3938_v24, %v3938_v24 }
 0xca1   : > { %5345 = vmatmul.mubr.msk.bf16.vlgmr.msra.gmra.mrb[64].mxu0 %vm7617_vm4, %v5344_v26  ;;  %6094 = vmatmul.mubr.msk.bf16.vlgmr.msra.gmra.mrb[48].mxu1 %vm7621_vm6, %v5349_v57 }
 0xca2   : > { %5793 = vmatpush3.bf16.msra.mxu0 %v6423_v55  ;;  %6098 = vmatpush3.bf16.msra.mxu1 %v6424_v25 }
 0xca3   : > { %5794 = vmatprep.subr.bf16.mxu0 %v6425_v27  ;;  %6099 = vmatprep.subr.bf16.mxu1 %v6494_v63 }
 0xca4   : > { %6113 = vmatprep.mubr.msk.bf16.mxu1 %vm6495_vm5, %v6494_v63 }
 0xca6   : > { %5795 = vmatpush3.bf16.msra.mxu0 %v6426_v53  ;;  %6100 = vmatpush3.bf16.msra.mxu1 %v6427_v28 }
 0xca7   : > { %5796 = vmatprep.subr.bf16.mxu0 %v6428_v29  ;;  %6101 = vmatprep.subr.bf16.mxu1 %v6494_v63 }
 0xcaa   : > { %5797 = vmatpush3.bf16.msra.mxu0 %v6429_v30  ;;  %6102 = vmatpush3.bf16.msra.mxu1 %v6430_v31 }
 0xcab   : > { %5798 = vmatprep.subr.bf16.mxu0 %v6431_v32  ;;  %6103 = vmatprep.subr.bf16.mxu1 %v6494_v63 }
 0xcae   : > { %5799 = vmatpush3.bf16.msra.mxu0 %v6432_v33  ;;  %6104 = vmatpush3.bf16.msra.mxu1 %v6433_v1 }
 0xcaf   : > { %5800 = vmatprep.subr.bf16.mxu0 %v6434_v3  ;;  %6105 = vmatprep.subr.bf16.mxu1 %v6494_v63 }
 0xcb2   : > { %5801 = vmatpush3.bf16.msra.mxu0 %v6435_v34  ;;  %6106 = vmatpush3.bf16.msra.mxu1 %v6436_v35 }
 0xcb3   : > { %6107 = vmatprep.subr.bf16.mxu1 %v6494_v63  ;;  %5802 = vmatprep.subr.bf16.mxu0 %v6437_v15 }
 0xcb6   : > { %5803 = vmatpush3.bf16.msra.mxu0 %v6438_v22  ;;  %6108 = vmatpush3.bf16.msra.mxu1 %v6439_v36 }
 0xcb7   : > { %6109 = vmatprep.subr.bf16.mxu1 %v6494_v63  ;;  %5804 = vmatprep.subr.bf16.mxu0 %v6440_v38 }
 0xcba   : > { %5805 = vmatpush3.bf16.msra.mxu0 %v6441_v39  ;;  %6110 = vmatpush3.bf16.msra.mxu1 %v6442_v40 }
 0xcbb   : > { %5806 = vmatprep.subr.bf16.mxu0 %v6443_v41  ;;  %6111 = vmatprep.subr.bf16.mxu1 %v6494_v63 }
 0xcbe   : > { %5807 = vmatpush3.bf16.msra.mxu0 %v6444_v42  ;;  %6112 = vmatpush3.bf16.msra.mxu1 %v6445_v44 }
 0xd74   : > { %v5777_v45 = vpop.f32.mrb[64].mxu0  ;;  %v4210_v46 = vpop.f32.mrb[48].mxu1 }
 0xd75   : > { %v5778_v47 = vpop.f32.mrb[65].mxu0  ;;  %v6095_v48 = vpop.f32.mrb[49].mxu1 }
 0xd76   : > { %v5779_v49 = vadd.f32 %v5778_v47, %v5777_v45  ;;  %v5780_v50 = vpop.f32.mrb[66].mxu0  ;;  %v4213_v52 = vpop.f32.mrb[50].mxu1 }
 0xd77   : > { %v5781_v56 = vpop.f32.mrb[67].mxu0  ;;  %v6096_v58 = vpop.f32.mrb[51].mxu1 }
 0xd78   : > { %v4211_v59 = vadd.f32 %v5779_v49, %v4210_v46 }
 0xd7a   : > { %vm4216_vm5 = vcmp.ge.f32.partialorder %v4211_v59, 0.0  ;;  %v4217_v60 = vmul.f32 %v4211_v59, %v6846_v37 }
 0xd7c   : > { %v4218_v62 = vsel %vm4216_vm5, %v4211_v59, %v4217_v60 }
 0xd7d   : > { %v4219_v13 = vrot.slane %v4218_v62, 7  ;;  %v4221_v16 = vrot.slane %v4218_v62, 1  ;;  %v4224_v63 = vpack.c.bf16 %v4218_v62, %v4218_v62 }
 0xd7f   : > { %4451 = vmatprep.mubr.bf16.mxu0 %v4224_v63  ;;  %v5378_v23 = vpack.c.bf16 %v4219_v13, %v4219_v13  ;;  %v5383_v43 = vpack.c.bf16 %v4221_v16, %v4221_v16 }
 0xd81   : > { %5379 = vmatmul.mubr.msk.bf16.vlgmr.msra.gmra.mrb[68].mxu0 %vm7617_vm4, %v5378_v23  ;;  %6114 = vmatmul.mubr.msk.bf16.vlgmr.msra.gmra.mrb[52].mxu1 %vm7621_vm6, %v5383_v43 }
 0xe54   : > { %v5808_v9 = vpop.f32.mrb[68].mxu0  ;;  %v4493_v51 = vpop.f32.mrb[52].mxu1 }
 0xe55   : > { %v5809_v54 = vpop.f32.mrb[69].mxu0  ;;  %v6115_v0 = vpop.f32.mrb[53].mxu1 }
 0xe56   : > { %v5810_v2 = vadd.f32 %v5809_v54, %v5808_v9  ;;  %v5811_v37 = vpop.f32.mrb[70].mxu0  ;;  %v4496_v4 = vpop.f32.mrb[54].mxu1 }
 0xe57   : > { %v5812_v5 = vpop.f32.mrb[71].mxu0  ;;  %v6116_v7 = vpop.f32.mrb[55].mxu1 }
 0xe58   : > { %v4494_v8 = vadd.f32 %v5810_v2, %v4493_v51 }
 0xe5a   : > { %v4499_v61 = vadd.f32 %v4494_v8, %v7655_v19 }
 0xe5c   : > { %4500 = vst [vmem:[%s425_s18] sm:$0xff] %v4499_v61 }
 0xe5d PF: > { %s24_s19 = sadd.s32 1, %s6488_s19  }
 0xe5e   : > { %p21_p3 = scmp.ge.s32.totalorder %s24_s19, 4  }
 0xe60   :  { %23 = sbr.rel (!%p21_p3) target bundleno = 3 (0x3), region = 124 }
 0xe67   :  { %4552 = vsyncpa [#allocation4], 1 }
 0xe68   :  { %4554 = vsyncpa [#allocation4 + $0x1], 1 }

</bundles_post_ra>
